<compile_context>
chip_gen: v7x
topology: tpu7x:2x2x1
jax: 0.10.0
libtpu: 0.0.40
codegen_flags: <defaults>
</compile_context>

<pallas_src>
import functools

import jax
import jax.numpy as jnp
from jax.experimental import pallas as pl
from jax.experimental.pallas import tpu as pltpu


def _softmax_loss_kernel(x_ref, w_ref, b_ref, lab_ref, out_ref, *,
                         total_batch, tile_b):
    i = pl.program_id(0)

    x = x_ref[...]          # (TB, D)     f32
    w = w_ref[...]          # (Cpad, D)   f32
    b = b_ref[...]          # (1, Cpad)   f32  (-1e30 on padded classes)
    labels = lab_ref[...]   # (TB, 1)     i32

    # fc: logits = x @ W.T + b  — MXU, f32 accumulation.
    logits = jax.lax.dot_general(
        x, w, dimension_numbers=(((1,), (1,)), ((), ())),
        preferred_element_type=jnp.float32) + b            # (TB, Cpad) f32
    tb, c = logits.shape

    # Mask rows past the true batch size (ragged last tile: OOB reads give
    # unspecified values, so everything derived from them is where()'d out).
    row_ids = jax.lax.broadcasted_iota(jnp.int32, (tb, 1), 0) + i * tile_b
    valid = row_ids < total_batch                           # (TB, 1) bool

    class_ids = jax.lax.broadcasted_iota(jnp.int32, (tb, c), 1)
    onehot = class_ids == labels                            # (TB, Cpad) bool

    # Cross entropy: lse(logits) - logits[label]   (3 lane reductions total)
    m = jnp.max(logits, axis=-1, keepdims=True)
    lse = m + jnp.log(jnp.sum(jnp.exp(logits - m), axis=-1, keepdims=True))
    picked = jnp.sum(jnp.where(onehot, logits, 0.0), axis=-1, keepdims=True)

    loss_part = jnp.sum(jnp.where(valid, lse - picked, 0.0))
    # Top-1 correct iff the label's logit attains the row max (see TODO above).
    correct_part = jnp.sum(
        jnp.logical_and(valid, picked == m).astype(jnp.float32))

    # Per-tile partials packed into lanes 0/1 of a lane-dense (1, 1, 128) block.
    lane = jax.lax.broadcasted_iota(jnp.int32, out_ref.shape, 2)
    out_ref[...] = jnp.where(lane == 0, loss_part,
                             jnp.where(lane == 1, correct_part, 0.0))


def softmax_loss(x, labels, weight, bias, *, tile_b=128):
    """x: (B, nOut) f32, labels: (B,) int, weight: (nClasses, nOut), bias: (nClasses,).

    Returns (nloss, prec1) as f32 scalars (CrossEntropyLoss mean + top-1 %).
    Default tile_b=128 keeps grid >= 2 (v7x megacore); pass tile_b=512 on
    single-TensorCore chips to collapse small batches to one grid step.
    """
    B, D = x.shape
    C, D2 = weight.shape
    assert D == D2

    # Clamp the batch tile: multiple of 8, <= 512, no larger than needed.
    tile_b = min(int(tile_b), 512, ((B + 7) // 8) * 8)
    tile_b = max(8, (tile_b // 8) * 8)
    num_tiles = pl.cdiv(B, tile_b)
    c_pad = pl.cdiv(C, 128) * 128

    # Parameter-side padding only (pre-computable once for a fixed module):
    # zero weight rows + bias = -1e30 keep padded classes out of max/LSE.
    x = jnp.asarray(x, jnp.float32)
    w_p = jnp.pad(jnp.asarray(weight, jnp.float32), ((0, c_pad - C), (0, 0)))
    bias_p = jnp.pad(jnp.asarray(bias, jnp.float32), (0, c_pad - C),
                     constant_values=-1e30).reshape(1, c_pad)
    lab_p = labels.astype(jnp.int32).reshape(B, 1)

    kernel = functools.partial(_softmax_loss_kernel,
                               total_batch=B, tile_b=tile_b)

    cost = pl.CostEstimate(
        flops=2 * B * D * c_pad,
        transcendentals=B * c_pad,
        bytes_accessed=(B * D + c_pad * D + c_pad + B) * 4 + num_tiles * 512,
    )

    partials = pl.pallas_call(
        kernel,
        out_shape=jax.ShapeDtypeStruct((num_tiles, 1, 128), jnp.float32),
        grid_spec=pltpu.PrefetchScalarGridSpec(
            num_scalar_prefetch=0,
            grid=(num_tiles,),
            in_specs=[
                pl.BlockSpec((tile_b, D), lambda i: (i, 0)),   # x tile (f32)
                pl.BlockSpec((c_pad, D), lambda i: (0, 0)),    # W (C,D) resident
                pl.BlockSpec((1, c_pad), lambda i: (0, 0)),    # bias resident
                pl.BlockSpec((tile_b, 1), lambda i: (i, 0)),   # labels tile
            ],
            out_specs=pl.BlockSpec((1, 1, 128), lambda i: (i, 0, 0)),
        ),
        compiler_params=pltpu.CompilerParams(
            dimension_semantics=("parallel",),   # independent per-tile partials
            vmem_limit_bytes=32 * 1024 * 1024),
        cost_estimate=cost,
    )(x, w_p, bias_p, lab_p)

    # Tiny wrapper reduction over per-tile partials (endorsed: enables megacore).
    loss_sum = jnp.sum(partials[:, 0, 0])
    correct = jnp.sum(partials[:, 0, 1])
    return loss_sum / B, correct * (100.0 / B)


def _reference(x, labels, weight, bias):
    logits = jnp.dot(x, weight.T, precision=jax.lax.Precision.HIGHEST) + bias
    lse = jax.nn.logsumexp(logits, axis=-1)
    picked = jnp.take_along_axis(logits, labels[:, None], axis=-1)[:, 0]
    nloss = jnp.mean(lse - picked)
    pred = jnp.argmax(logits, axis=-1)
    prec1 = jnp.sum((pred == labels).astype(jnp.float32)) * 100.0 / x.shape[0]
    return nloss, prec1


if __name__ == "__main__":
    nOut, nClasses, B = 512, 251, 200   # default module dims; 2 ragged tiles of 128

    key = jax.random.PRNGKey(0)
    kx, kw, kb, kl = jax.random.split(key, 4)

    # deterministic nn.Linear-style init: U(-1/sqrt(nOut), 1/sqrt(nOut))
    bound = 1.0 / (nOut ** 0.5)
    weight = jax.random.uniform(kw, (nClasses, nOut), jnp.float32, -bound, bound)
    bias = jax.random.uniform(kb, (nClasses,), jnp.float32, -bound, bound)

    x = jax.random.normal(kx, (B, nOut), jnp.float32)
    labels = jax.random.randint(kl, (B,), 0, nClasses, jnp.int32)

    nloss, prec1 = jax.jit(softmax_loss)(x, labels, weight, bias)
    jax.block_until_ready((nloss, prec1))

    ref_loss, ref_prec = _reference(x, labels, weight, bias)

    # Loss: f32 end-to-end, only matmul-rounding differences remain.
    assert jnp.allclose(nloss, ref_loss, rtol=5e-3, atol=5e-3), (nloss, ref_loss)
    # prec1: allow at most one argmax flip (100/B) for near-tie rounding.
    assert jnp.abs(prec1 - ref_prec) <= 100.0 / B + 1e-3, (prec1, ref_prec)

    print("KERNEL_OK")
</pallas_src>

<mosaic_0001>
module attributes {stable_mosaic.version = 11 : i64} {
  func.func @_softmax_loss_kernel(%arg0: i32, %arg1: memref<128x512xf32, #tpu.memory_space<vmem>>, %arg2: memref<256x512xf32, #tpu.memory_space<vmem>>, %arg3: memref<1x256xf32, #tpu.memory_space<vmem>>, %arg4: memref<128x1xi32, #tpu.memory_space<vmem>>, %arg5: memref<1x1x128xf32, #tpu.memory_space<vmem>>) attributes {dimension_semantics = [#tpu.dimension_semantics<parallel>], iteration_bounds = array<i64: 2>, scalar_prefetch = 0 : i64, scratch_operands = 0 : i64, tpu.core_type = #tpu.core_type<tc>, window_params = [{transform_indices = @transform_0, window_bounds = array<i64: 128, 512>}, {pipeline_mode = #tpu.pipeline_mode<synchronous>, transform_indices = @transform_1, window_bounds = array<i64: 256, 512>}, {pipeline_mode = #tpu.pipeline_mode<synchronous>, transform_indices = @transform_2, window_bounds = array<i64: 1, 256>}, {transform_indices = @transform_3, window_bounds = array<i64: 128, 1>}, {transform_indices = @transform_4, window_bounds = array<i64: 1, 1, 128>}]} {
    %c0 = arith.constant 0 : index
    %c0_0 = arith.constant 0 : index
    %0 = vector.load %arg1[%c0, %c0_0] : memref<128x512xf32, #tpu.memory_space<vmem>>, vector<128x512xf32>
    %c0_1 = arith.constant 0 : index
    %c0_2 = arith.constant 0 : index
    %1 = vector.load %arg2[%c0_1, %c0_2] : memref<256x512xf32, #tpu.memory_space<vmem>>, vector<256x512xf32>
    %c0_3 = arith.constant 0 : index
    %c0_4 = arith.constant 0 : index
    %2 = vector.load %arg3[%c0_3, %c0_4] : memref<1x256xf32, #tpu.memory_space<vmem>>, vector<1x256xf32>
    %c0_5 = arith.constant 0 : index
    %c0_6 = arith.constant 0 : index
    %3 = vector.load %arg4[%c0_5, %c0_6] : memref<128x1xi32, #tpu.memory_space<vmem>>, vector<128x1xi32>
    %cst = arith.constant dense<0.000000e+00> : vector<128x256xf32>
    %4 = tpu.matmul %0, %1, %cst {dimension_numbers = #tpu.dot_dimension_numbers<[1], [1], [0], [0], [0, 0, 1, 0], [], []>} : vector<128x512xf32>, vector<256x512xf32>, vector<128x256xf32> -> vector<128x256xf32>
    %5 = vector.broadcast %2 : vector<1x256xf32> to vector<128x256xf32>
    %6 = arith.addf %4, %5 : vector<128x256xf32>
    %7 = tpu.iota {dimensions = array<i32: 0>} : vector<128x1xi32>
    %c128_i32 = arith.constant 128 : i32
    %8 = arith.muli %arg0, %c128_i32 : i32
    %9 = vector.broadcast %8 : i32 to vector<128x1xi32>
    %10 = arith.addi %7, %9 : vector<128x1xi32>
    %c200_i32 = arith.constant 200 : i32
    %11 = vector.broadcast %c200_i32 : i32 to vector<128x1xi32>
    %12 = arith.cmpi slt, %10, %11 : vector<128x1xi32>
    %13 = tpu.iota {dimensions = array<i32: 1>} : vector<128x256xi32>
    %14 = vector.broadcast %3 : vector<128x1xi32> to vector<128x256xi32>
    %15 = arith.cmpi eq, %13, %14 : vector<128x256xi32>
    %cst_7 = arith.constant dense<0xFF800000> : vector<128xf32>
    %16 = vector.multi_reduction <maximumf>, %6, %cst_7 [1] : vector<128x256xf32> to vector<128xf32>
    %17 = vector.shape_cast %16 : vector<128xf32> to vector<128x1xf32>
    %18 = vector.broadcast %17 : vector<128x1xf32> to vector<128x256xf32>
    %19 = arith.subf %6, %18 : vector<128x256xf32>
    %20 = math.exp %19 : vector<128x256xf32>
    %cst_8 = arith.constant dense<0.000000e+00> : vector<128xf32>
    %21 = vector.multi_reduction <add>, %20, %cst_8 [1] : vector<128x256xf32> to vector<128xf32>
    %22 = vector.shape_cast %21 : vector<128xf32> to vector<128x1xf32>
    %23 = math.log %22 : vector<128x1xf32>
    %24 = arith.addf %17, %23 : vector<128x1xf32>
    %cst_9 = arith.constant 0.000000e+00 : f32
    %25 = vector.broadcast %cst_9 : f32 to vector<128x256xf32>
    %26 = arith.select %15, %6, %25 : vector<128x256xi1>, vector<128x256xf32>
    %cst_10 = arith.constant dense<0.000000e+00> : vector<128xf32>
    %27 = vector.multi_reduction <add>, %26, %cst_10 [1] : vector<128x256xf32> to vector<128xf32>
    %28 = vector.shape_cast %27 : vector<128xf32> to vector<128x1xf32>
    %29 = arith.subf %24, %28 : vector<128x1xf32>
    %cst_11 = arith.constant 0.000000e+00 : f32
    %30 = vector.broadcast %cst_11 : f32 to vector<128x1xf32>
    %31 = arith.select %12, %29, %30 : vector<128x1xi1>, vector<128x1xf32>
    %32 = vector.shape_cast %31 : vector<128x1xf32> to vector<1x128x1xf32>
    %cst_12 = arith.constant dense<0.000000e+00> : vector<1xf32>
    %33 = vector.multi_reduction <add>, %32, %cst_12 [1, 2] : vector<1x128x1xf32> to vector<1xf32>
    %34 = vector.shape_cast %33 : vector<1xf32> to vector<1x1x1xf32>
    %35 = vector.extract %34[0, 0, 0] : f32 from vector<1x1x1xf32>
    %36 = arith.cmpf oeq, %28, %17 : vector<128x1xf32>
    %37 = arith.andi %12, %36 : vector<128x1xi1>
    %38 = arith.extui %37 : vector<128x1xi1> to vector<128x1xi32>
    %39 = arith.sitofp %38 : vector<128x1xi32> to vector<128x1xf32>
    %40 = vector.shape_cast %39 : vector<128x1xf32> to vector<1x128x1xf32>
    %cst_13 = arith.constant dense<0.000000e+00> : vector<1xf32>
    %41 = vector.multi_reduction <add>, %40, %cst_13 [1, 2] : vector<1x128x1xf32> to vector<1xf32>
    %42 = vector.shape_cast %41 : vector<1xf32> to vector<1x1x1xf32>
    %43 = vector.extract %42[0, 0, 0] : f32 from vector<1x1x1xf32>
    %44 = tpu.iota {dimensions = array<i32: 2>} : vector<1x1x128xi32>
    %c0_i32 = arith.constant 0 : i32
    %45 = vector.broadcast %c0_i32 : i32 to vector<1x1x128xi32>
    %46 = arith.cmpi eq, %44, %45 : vector<1x1x128xi32>
    %c1_i32 = arith.constant 1 : i32
    %47 = vector.broadcast %c1_i32 : i32 to vector<1x1x128xi32>
    %48 = arith.cmpi eq, %44, %47 : vector<1x1x128xi32>
    %cst_14 = arith.constant 0.000000e+00 : f32
    %49 = vector.broadcast %43 : f32 to vector<1x1x128xf32>
    %50 = vector.broadcast %cst_14 : f32 to vector<1x1x128xf32>
    %51 = arith.select %48, %49, %50 : vector<1x1x128xi1>, vector<1x1x128xf32>
    %52 = vector.broadcast %35 : f32 to vector<1x1x128xf32>
    %53 = arith.select %46, %52, %51 : vector<1x1x128xi1>, vector<1x1x128xf32>
    %c0_15 = arith.constant 0 : index
    %c0_16 = arith.constant 0 : index
    %c0_17 = arith.constant 0 : index
    %54 = vector.load %arg5[%c0_15, %c0_16, %c0_17] : memref<1x1x128xf32, #tpu.memory_space<vmem>>, vector<1x1x128xf32>
    tpu.vector_store %arg5[%c0_15, %c0_16, %c0_17], %53 {strides = array<i32>} : memref<1x1x128xf32, #tpu.memory_space<vmem>>, vector<1x1x128xf32>,
    return
  }
  func.func @transform_0(%arg0: i32) -> (i32, i32) {
    %c0_i32 = arith.constant 0 : i32
    %c0_i32_0 = arith.constant 0 : i32
    return %arg0, %c0_i32 : i32, i32
  }
  func.func @transform_1(%arg0: i32) -> (i32, i32) {
    %c0_i32 = arith.constant 0 : i32
    %c0_i32_0 = arith.constant 0 : i32
    %c0_i32_1 = arith.constant 0 : i32
    return %c0_i32, %c0_i32_0 : i32, i32
  }
  func.func @transform_2(%arg0: i32) -> (i32, i32) {
    %c0_i32 = arith.constant 0 : i32
    %c0_i32_0 = arith.constant 0 : i32
    %c0_i32_1 = arith.constant 0 : i32
    return %c0_i32, %c0_i32_0 : i32, i32
  }
  func.func @transform_3(%arg0: i32) -> (i32, i32) {
    %c0_i32 = arith.constant 0 : i32
    %c0_i32_0 = arith.constant 0 : i32
    return %arg0, %c0_i32 : i32, i32
  }
  func.func @transform_4(%arg0: i32) -> (i32, i32, i32) {
    %c0_i32 = arith.constant 0 : i32
    %c0_i32_0 = arith.constant 0 : i32
    %c0_i32_1 = arith.constant 0 : i32
    return %arg0, %c0_i32, %c0_i32_0 : i32, i32, i32
  }
}

</mosaic_0001>

<bundles_post_ra>
// kernel: softmax_loss.1
= control target key start
LH: loop header
LB: loop body
LE: loop exit
PB: predicated region body
PF: predicated region fallthrough
CT: control target
= control target key end

     0   :  { %s1874_s15 = smov 0   ;;  %s3073_s0 = inlined_call_operand.vmem [shape: f32[200,512], index: 0, kind: input, shape index: {}]   ;;  %s3074_s1 = inlined_call_operand.vmem [shape: f32[256,512], index: 1, kind: input, shape index: {}]   ;;  %s3075_s2 = inlined_call_operand.vmem [shape: f32[1,256], index: 2, kind: input, shape index: {}]   ;;  %s3076_s3 = inlined_call_operand.vmem [shape: s32[200,1], index: 3, kind: input, shape index: {}]   ;;  %s3077_s4 = inlined_call_operand.vmem [shape: f32[2,1,128], index: 4, kind: output, shape index: {}]  }
   0x1 LB: > { %s1880_s16 = sadd.s32 4294967295, %s1845_s15   ;;  %p1509_p0 = scmp.ge.s32.totalorder %s1845_s15, 1  ;;  %s1845_s15 = sphi %s1874_s15, %s14_s15  }
   0x2   : > { %p193_p1 = scmp.lt.s32.totalorder %s1845_s15, 3 }
   0x4   : > { %p194_p2 = pnand %p1509_p0, %p193_p1 }
   0x5   : > { %v331_v0 = vld [vmem:[%s3074_s1 + $0x8] sm:$0xff] (!%p194_p2)  ;;  %v330_v2 = vld [vmem:[%s3074_s1] sm:$0xff] (!%p194_p2)  ;;  %v333_v5 = vld [vmem:[%s3074_s1 + $0x18] sm:$0xff] (!%p194_p2)  ;;  %s1510_s17 = sshll.u32 (!%p194_p2), %s1880_s16, 4  ;;  %p263_p4 = scmp.lt.s32.totalorder (!%p194_p2), %s1880_s16, 1 }
   0x6   : > { %197 = sbr.rel (%p194_p2) target bundleno = 949 (0x3b5), region = 36  ;;  %v335_v1 = vld [vmem:[%s3074_s1 + $0x28] sm:$0xff] (!%p194_p2)  ;;  %v334_v4 = vld [vmem:[%s3074_s1 + $0x20] sm:$0xff] (!%p194_p2)  ;;  %v337_v6 = vld [vmem:[%s3074_s1 + $0x38] sm:$0xff] (!%p194_p2)  ;;  %p238_p3 = scmp.lt.s32.totalorder (!%p194_p2), %s1510_s17, 24 }
   0x7   : > { %v1535_v3 = vpack.c.bf16 (!%p194_p2), %v335_v1, %v331_v0  ;;  %v1537_v7 = vpack.c.bf16 (!%p194_p2), %v334_v4, %v330_v2  ;;  %v1599_v8 = vpack.c.bf16 (!%p194_p2), %v337_v6, %v333_v5  ;;  %v332_v9 = vld [vmem:[%s3074_s1 + $0x10] sm:$0xff] (!%p194_p2)  ;;  %v339_v11 = vld [vmem:[%s3074_s1 + $0x48] sm:$0xff] (!%p194_p2)  ;;  %v341_v15 = vld [vmem:[%s3074_s1 + $0x58] sm:$0xff] (!%p194_p2) }
   0x8   : > { %v336_v10 = vld [vmem:[%s3074_s1 + $0x30] sm:$0xff] (!%p194_p2)  ;;  %v343_v13 = vld [vmem:[%s3074_s1 + $0x68] sm:$0xff] (!%p194_p2)  ;;  %v345_v16 = vld [vmem:[%s3074_s1 + $0x78] sm:$0xff] (!%p194_p2) }
   0x9   : > { %1536 = vmatprep.subr.bf16.mxu1 (!%p194_p2), %v1535_v3  ;;  %v1601_v12 = vpack.c.bf16 (!%p194_p2), %v336_v10, %v332_v9  ;;  %1600 = vmatprep.subr.bf16.mxu0 (!%p194_p2), %v1599_v8  ;;  %v1539_v14 = vpack.c.bf16 (!%p194_p2), %v343_v13, %v339_v11  ;;  %v338_v17 = vld [vmem:[%s3074_s1 + $0x40] sm:$0xff] (!%p194_p2)  ;;  %v1603_v19 = vpack.c.bf16 (!%p194_p2), %v345_v16, %v341_v15  ;;  %v340_v20 = vld [vmem:[%s3074_s1 + $0x50] sm:$0xff] (!%p194_p2)  ;;  %v347_v22 = vld [vmem:[%s3074_s1 + $0x88] sm:$0xff] (!%p194_p2) }
   0xa   : > { %1538 = vmatpush1.bf16.xpose.msra.mxu1 (!%p194_p2), %v1537_v7  ;;  %v342_v18 = vld [vmem:[%s3074_s1 + $0x60] sm:$0xff] (!%p194_p2)  ;;  %v344_v21 = vld [vmem:[%s3074_s1 + $0x70] sm:$0xff] (!%p194_p2)  ;;  %v351_v23 = vld [vmem:[%s3074_s1 + $0xa8] sm:$0xff] (!%p194_p2) }
   0xb   : > { %1602 = vmatpush1.bf16.xpose.msra.mxu0 (!%p194_p2), %v1601_v12  ;;  %1540 = vmatprep.subr.bf16.mxu1 (!%p194_p2), %v1539_v14  ;;  %v349_v24 = vld [vmem:[%s3074_s1 + $0x98] sm:$0xff] (!%p194_p2)  ;;  %v1541_v26 = vpack.c.bf16 (!%p194_p2), %v342_v18, %v338_v17  ;;  %v1605_v27 = vpack.c.bf16 (!%p194_p2), %v344_v21, %v340_v20  ;;  %v1543_v28 = vpack.c.bf16 (!%p194_p2), %v351_v23, %v347_v22  ;;  %v346_v30 = vld [vmem:[%s3074_s1 + $0x80] sm:$0xff] (!%p194_p2)  ;;  %v348_v32 = vld [vmem:[%s3074_s1 + $0x90] sm:$0xff] (!%p194_p2) }
   0xc   : > { %1604 = vmatprep.subr.bf16.mxu0 (!%p194_p2), %v1603_v19  ;;  %v353_v25 = vld [vmem:[%s3074_s1 + $0xb8] sm:$0xff] (!%p194_p2)  ;;  %v350_v31 = vld [vmem:[%s3074_s1 + $0xa0] sm:$0xff] (!%p194_p2)  ;;  %v352_v33 = vld [vmem:[%s3074_s1 + $0xb0] sm:$0xff] (!%p194_p2) }
   0xd   : > { %v1607_v29 = vpack.c.bf16 %v353_v25, %v349_v24  ;;  %v355_v34 = vld [vmem:[%s3074_s1 + $0xc8] sm:$0xff]  ;;  %v357_v36 = vld [vmem:[%s3074_s1 + $0xd8] sm:$0xff]  ;;  %v1545_v38 = vpack.c.bf16 %v350_v31, %v346_v30  ;;  %v1609_v39 = vpack.c.bf16 %v352_v33, %v348_v32  ;;  %v354_v42 = vld [vmem:[%s3074_s1 + $0xc0] sm:$0xff]  ;;  %s3095_s17 = smov (!%p238_p3, %s1510_s17), 24 }
   0xe   : > { %v359_v35 = vld [vmem:[%s3074_s1 + $0xe8] sm:$0xff]  ;;  %v361_v37 = vld [vmem:[%s3074_s1 + $0xf8] sm:$0xff]  ;;  %v358_v43 = vld [vmem:[%s3074_s1 + $0xe0] sm:$0xff]  ;;  %s1534_s8 = sshll.u32 %s3095_s17, 5  ;;  %s1514_s9 = sshll.u32 %s3095_s17, 3 }
   0xf   : > { %v1547_v40 = vpack.c.bf16 %v359_v35, %v355_v34  ;;  %v1611_v41 = vpack.c.bf16 %v361_v37, %v357_v36  ;;  %v356_v44 = vld [vmem:[%s3074_s1 + $0xd0] sm:$0xff]  ;;  %v363_v46 = vld [vmem:[%s3074_s1 + $0x108] sm:$0xff]  ;;  %v365_v48 = vld [vmem:[%s3074_s1 + $0x118] sm:$0xff]  ;;  %v1549_v50 = vpack.c.bf16 %v358_v43, %v354_v42  ;;  %s2047_s30 = scalar_lea.vmem %s3073_s0, %s1534_s8  ;;  %s2127_s12 = scalar_lea.vmem %s3076_s3, %s1514_s9 }
  0x10   : > { %v360_v45 = vld [vmem:[%s3074_s1 + $0xf0] sm:$0xff]  ;;  %v367_v47 = vld [vmem:[%s3074_s1 + $0x128] sm:$0xff]  ;;  %v369_v49 = vld [vmem:[%s3074_s1 + $0x138] sm:$0xff] }
  0x11   : > { %v1613_v51 = vpack.c.bf16 %v360_v45, %v356_v44  ;;  %v1551_v52 = vpack.c.bf16 %v367_v47, %v363_v46  ;;  %v1615_v53 = vpack.c.bf16 %v369_v49, %v365_v48  ;;  %v362_v54 = vld [vmem:[%s3074_s1 + $0x100] sm:$0xff]  ;;  %v364_v56 = vld [vmem:[%s3074_s1 + $0x110] sm:$0xff]  ;;  %v371_v58 = vld [vmem:[%s3074_s1 + $0x148] sm:$0xff] }
  0x12   : > { %1542 = vmatpush1.bf16.xpose.msra.mxu1 %v1541_v26  ;;  %v366_v55 = vld [vmem:[%s3074_s1 + $0x120] sm:$0xff]  ;;  %v368_v57 = vld [vmem:[%s3074_s1 + $0x130] sm:$0xff]  ;;  %v375_v59 = vld [vmem:[%s3074_s1 + $0x168] sm:$0xff] }
  0x13   : > { %1606 = vmatpush1.bf16.xpose.msra.mxu0 %v1605_v27  ;;  %1544 = vmatprep.subr.bf16.mxu1 %v1543_v28  ;;  %v373_v60 = vld [vmem:[%s3074_s1 + $0x158] sm:$0xff]  ;;  %v1553_v62 = vpack.c.bf16 %v366_v55, %v362_v54  ;;  %v1617_v63 = vpack.c.bf16 %v368_v57, %v364_v56  ;;  %v1555_v0 = vpack.c.bf16 %v375_v59, %v371_v58  ;;  %v370_v2 = vld [vmem:[%s3074_s1 + $0x140] sm:$0xff]  ;;  %v372_v4 = vld [vmem:[%s3074_s1 + $0x150] sm:$0xff] }
  0x14   : > { %1608 = vmatprep.subr.bf16.mxu0 %v1607_v29  ;;  %v377_v61 = vld [vmem:[%s3074_s1 + $0x178] sm:$0xff]  ;;  %v374_v3 = vld [vmem:[%s3074_s1 + $0x160] sm:$0xff]  ;;  %v376_v5 = vld [vmem:[%s3074_s1 + $0x170] sm:$0xff] }
  0x15   : > { %v1619_v1 = vpack.c.bf16 %v377_v61, %v373_v60  ;;  %v379_v6 = vld [vmem:[%s3074_s1 + $0x188] sm:$0xff]  ;;  %v381_v8 = vld [vmem:[%s3074_s1 + $0x198] sm:$0xff]  ;;  %v1557_v10 = vpack.c.bf16 %v374_v3, %v370_v2  ;;  %v1621_v11 = vpack.c.bf16 %v376_v5, %v372_v4  ;;  %v378_v16 = vld [vmem:[%s3074_s1 + $0x180] sm:$0xff] }
  0x16   : > { %v383_v7 = vld [vmem:[%s3074_s1 + $0x1a8] sm:$0xff]  ;;  %v385_v9 = vld [vmem:[%s3074_s1 + $0x1b8] sm:$0xff]  ;;  %v382_v17 = vld [vmem:[%s3074_s1 + $0x1a0] sm:$0xff] }
  0x17   : > { %v1559_v12 = vpack.c.bf16 %v383_v7, %v379_v6  ;;  %v1623_v13 = vpack.c.bf16 %v385_v9, %v381_v8  ;;  %v267_v14 = vld [vmem:[%s2047_s30 + $0x8] sm:$0xff]  ;;  %v269_v15 = vld [vmem:[%s2047_s30 + $0x18] sm:$0xff]  ;;  %v380_v18 = vld [vmem:[%s3074_s1 + $0x190] sm:$0xff]  ;;  %v1561_v24 = vpack.c.bf16 %v382_v17, %v378_v16 }
  0x18   : > { %550 = vmatprep.mubr.f32.mxu1 %v267_v14  ;;  %711 = vmatprep.mubr.f32.mxu0 %v269_v15  ;;  %v384_v19 = vld [vmem:[%s3074_s1 + $0x1b0] sm:$0xff]  ;;  %v387_v20 = vld [vmem:[%s3074_s1 + $0x1c8] sm:$0xff]  ;;  %v389_v22 = vld [vmem:[%s3074_s1 + $0x1d8] sm:$0xff] }
  0x19   : > { %v391_v21 = vld [vmem:[%s3074_s1 + $0x1e8] sm:$0xff]  ;;  %v393_v23 = vld [vmem:[%s3074_s1 + $0x1f8] sm:$0xff]  ;;  %v1625_v25 = vpack.c.bf16 %v384_v19, %v380_v18  ;;  %v386_v28 = vld [vmem:[%s3074_s1 + $0x1c0] sm:$0xff] }
  0x1a   : > { %1546 = vmatpush1.bf16.xpose.msra.mxu1 %v1545_v38  ;;  %v1563_v26 = vpack.c.bf16 %v391_v21, %v387_v20  ;;  %v1627_v27 = vpack.c.bf16 %v393_v23, %v389_v22  ;;  %v390_v29 = vld [vmem:[%s3074_s1 + $0x1e0] sm:$0xff]  ;;  %v388_v30 = vld [vmem:[%s3074_s1 + $0x1d0] sm:$0xff]  ;;  %v395_v32 = vld [vmem:[%s3074_s1 + $0x208] sm:$0xff] }
  0x1b   : > { %1610 = vmatpush1.bf16.xpose.msra.mxu0 %v1609_v39  ;;  %1548 = vmatprep.subr.bf16.mxu1 %v1547_v40  ;;  %v392_v31 = vld [vmem:[%s3074_s1 + $0x1f0] sm:$0xff]  ;;  %v399_v33 = vld [vmem:[%s3074_s1 + $0x228] sm:$0xff]  ;;  %v397_v34 = vld [vmem:[%s3074_s1 + $0x218] sm:$0xff]  ;;  %v1565_v36 = vpack.c.bf16 %v390_v29, %v386_v28 }
  0x1c   : > { %1612 = vmatprep.subr.bf16.mxu0 %v1611_v41  ;;  %v401_v35 = vld [vmem:[%s3074_s1 + $0x238] sm:$0xff]  ;;  %v1629_v37 = vpack.c.bf16 %v392_v31, %v388_v30  ;;  %v1567_v38 = vpack.c.bf16 %v399_v33, %v395_v32  ;;  %v394_v40 = vld [vmem:[%s3074_s1 + $0x200] sm:$0xff]  ;;  %v396_v42 = vld [vmem:[%s3074_s1 + $0x210] sm:$0xff] }
  0x1d   : > { %v1631_v39 = vpack.c.bf16 %v401_v35, %v397_v34  ;;  %v398_v41 = vld [vmem:[%s3074_s1 + $0x220] sm:$0xff]  ;;  %v400_v43 = vld [vmem:[%s3074_s1 + $0x230] sm:$0xff]  ;;  %v403_v44 = vld [vmem:[%s3074_s1 + $0x248] sm:$0xff] }
  0x1e   : > { %v407_v45 = vld [vmem:[%s3074_s1 + $0x268] sm:$0xff]  ;;  %v405_v46 = vld [vmem:[%s3074_s1 + $0x258] sm:$0xff]  ;;  %v1569_v48 = vpack.c.bf16 %v398_v41, %v394_v40  ;;  %v1633_v49 = vpack.c.bf16 %v400_v43, %v396_v42  ;;  %v402_v55 = vld [vmem:[%s3074_s1 + $0x240] sm:$0xff] }
  0x1f   : > { %v409_v47 = vld [vmem:[%s3074_s1 + $0x278] sm:$0xff]  ;;  %v460_v54 = vld [vmem:[%s2127_s12 + $0x8] sm:$0xff]  ;;  %v461_v56 = vld [vmem:[%s2127_s12 + $0x10] sm:$0xff] }
  0x20   : > { %v406_v57 = vld [vmem:[%s3074_s1 + $0x260] sm:$0xff]  ;;  %v404_v58 = vld [vmem:[%s3074_s1 + $0x250] sm:$0xff]  ;;  %v468_v59 = vld [vmem:[%s2127_s12 + $0x48] sm:$0xff] }
  0x21   : > { %v408_v60 = vld [vmem:[%s3074_s1 + $0x270] sm:$0xff]  ;;  %v411_v61 = vld [vmem:[%s3074_s1 + $0x288] sm:$0xff]  ;;  %v462_v2 = vld [vmem:[%s2127_s12 + $0x18] sm:$0xff] }
  0x22   : > { %1550 = vmatpush1.bf16.xpose.msra.mxu1 %v1549_v50  ;;  %v1571_v50 = vpack.c.bf16 %v407_v45, %v403_v44  ;;  %v470_v3 = vld [vmem:[%s2127_s12 + $0x58] sm:$0xff]  ;;  %v1637_v4 = vpack.c.bf16 %v408_v60, %v404_v58  ;;  %v463_v7 = vld [vmem:[%s2127_s12 + $0x20] sm:$0xff]  ;;  %v472_v8 = vld [vmem:[%s2127_s12 + $0x68] sm:$0xff] }
  0x23   : > { %1614 = vmatpush1.bf16.xpose.msra.mxu0 %v1613_v51  ;;  %1552 = vmatprep.subr.bf16.mxu1 %v1551_v52  ;;  %v1847_v51 = vmov 0   ;;  %v1635_v52 = vpack.c.bf16 %v409_v47, %v405_v46  ;;  %v410_v9 = vld [vmem:[%s3074_s1 + $0x280] sm:$0xff]  ;;  %v423_v14 = vld [vmem:[%s3074_s1 + $0x2e8] sm:$0xff]  ;;  %v421_v15 = vld [vmem:[%s3074_s1 + $0x2d8] sm:$0xff] }
  0x24   : > { %1616 = vmatprep.subr.bf16.mxu0 %v1615_v53  ;;  %1741 = vset.pattern.permute.xlu0 %v1847_v51  ;;  %v459_v53 = vld [vmem:[%s2127_s12] sm:$0xff]  ;;  %v425_v16 = vld [vmem:[%s3074_s1 + $0x2f8] sm:$0xff]  ;;  %v464_v18 = vld [vmem:[%s2127_s12 + $0x28] sm:$0xff] }
  0x25   : > { %1742 = vset.pattern.permute.xlu1 %v1847_v51  ;;  %863 = vperm.xlu0 %1741, %v459_v53   ;;  %v1643_v21 = vpack.c.bf16 %v425_v16, %v421_v15  ;;  %v465_v22 = vld [vmem:[%s2127_s12 + $0x30] sm:$0xff]  ;;  %v418_v23 = vld [vmem:[%s3074_s1 + $0x2c0] sm:$0xff]  ;;  %v431_v28 = vld [vmem:[%s3074_s1 + $0x328] sm:$0xff] }
  0x26   : > { %866 = vperm.xlu1 %1742, %v460_v54   ;;  %v429_v29 = vld [vmem:[%s3074_s1 + $0x318] sm:$0xff]  ;;  %v432_v40 = vld [vmem:[%s3074_s1 + $0x330] sm:$0xff]  ;;  %v435_v41 = vld [vmem:[%s3074_s1 + $0x348] sm:$0xff] }
  0x27   : > { %v433_v30 = vld [vmem:[%s3074_s1 + $0x338] sm:$0xff]  ;;  %v439_v42 = vld [vmem:[%s3074_s1 + $0x368] sm:$0xff]  ;;  %v469_v46 = vld [vmem:[%s2127_s12 + $0x50] sm:$0xff] }
  0x28   : > { %v466_v32 = vld [vmem:[%s2127_s12 + $0x38] sm:$0xff]  ;;  %v1647_v35 = vpack.c.bf16 %v433_v30, %v429_v29  ;;  %v434_v51 = vld [vmem:[%s3074_s1 + $0x340] sm:$0xff]  ;;  %v436_v53 = vld [vmem:[%s3074_s1 + $0x350] sm:$0xff] }
  0x29   : > { %890 = vperm.xlu0 %1741, %v468_v59   ;;  %v437_v43 = vld [vmem:[%s3074_s1 + $0x358] sm:$0xff]  ;;  %v440_v54 = vld [vmem:[%s3074_s1 + $0x370] sm:$0xff]  ;;  %v278_v29 = vld [vmem:[%s2047_s30 + $0x60] sm:$0xff] }
  0x2a   : > { %1554 = vmatpush1.bf16.xpose.msra.mxu1 %v1553_v62  ;;  %v415_v62 = vld [vmem:[%s3074_s1 + $0x2a8] sm:$0xff]  ;;  %869 = vperm.xlu1 %1742, %v461_v56   ;;  %v441_v44 = vld [vmem:[%s3074_s1 + $0x378] sm:$0xff]  ;;  %v1653_v60 = vpack.c.bf16 %v440_v54, %v436_v53  ;;  %v280_v30 = vld [vmem:[%s2047_s30 + $0x70] sm:$0xff] }
  0x2b   : > { %1618 = vmatpush1.bf16.xpose.msra.mxu0 %v1617_v63  ;;  %1556 = vmatprep.subr.bf16.mxu1 %v1555_v0  ;;  %v413_v63 = vld [vmem:[%s3074_s1 + $0x298] sm:$0xff]  ;;  %v1575_v5 = vpack.c.bf16 %v415_v62, %v411_v61  ;;  %v447_v56 = vld [vmem:[%s3074_s1 + $0x3a8] sm:$0xff]  ;;  %v302_v53 = vld [vmem:[%s2047_s30 + $0x120] sm:$0xff] }
  0x2c   : > { %1620 = vmatprep.subr.bf16.mxu0 %v1619_v1  ;;  %v417_v0 = vld [vmem:[%s3074_s1 + $0x2b8] sm:$0xff]  ;;  %v1573_v1 = vpack.c.bf16 %v406_v57, %v402_v55  ;;  %v443_v55 = vld [vmem:[%s3074_s1 + $0x388] sm:$0xff]  ;;  %v304_v54 = vld [vmem:[%s2047_s30 + $0x130] sm:$0xff] }
  0x2d   : > { %v1639_v6 = vpack.c.bf16 %v417_v0, %v413_v63  ;;  %896 = vperm.xlu0 %1741, %v470_v3   ;;  %v445_v57 = vld [vmem:[%s3074_s1 + $0x398] sm:$0xff]  ;;  %v1591_v61 = vpack.c.bf16 %v447_v56, %v443_v55  ;;  %v442_v63 = vld [vmem:[%s3074_s1 + $0x380] sm:$0xff]  ;;  %v451_v3 = vld [vmem:[%s3074_s1 + $0x3c8] sm:$0xff] }
  0x2e   : > { %872 = vperm.xlu1 %1742, %v462_v2   ;;  %v449_v58 = vld [vmem:[%s3074_s1 + $0x3b8] sm:$0xff]  ;;  %v446_v0 = vld [vmem:[%s3074_s1 + $0x3a0] sm:$0xff]  ;;  %v448_v2 = vld [vmem:[%s3074_s1 + $0x3b0] sm:$0xff] }
  0x2f   : > { %v1655_v62 = vpack.c.bf16 %v449_v58, %v445_v57  ;;  %v307_v55 = vld [vmem:[%s2047_s30 + $0x148] sm:$0xff]  ;;  %v309_v56 = vld [vmem:[%s2047_s30 + $0x158] sm:$0xff]  ;;  %v306_v57 = vld [vmem:[%s2047_s30 + $0x140] sm:$0xff] }
  0x30   : > { %v308_v58 = vld [vmem:[%s2047_s30 + $0x150] sm:$0xff] }
  0x31   : > { %902 = vperm.xlu0 %1741, %v472_v8  }
  0x32   : > { %1558 = vmatpush1.bf16.xpose.msra.mxu1 %v1557_v10  ;;  %v414_v10 = vld [vmem:[%s3074_s1 + $0x2a0] sm:$0xff]  ;;  %875 = vperm.xlu1 %1742, %v463_v7   ;;  %v1593_v7 = vpack.c.bf16 %v446_v0, %v442_v63  ;;  %v315_v63 = vld [vmem:[%s2047_s30 + $0x188] sm:$0xff]  ;;  %v317_v0 = vld [vmem:[%s2047_s30 + $0x198] sm:$0xff] }
  0x33   : > { %1622 = vmatpush1.bf16.xpose.msra.mxu0 %v1621_v11  ;;  %1560 = vmatprep.subr.bf16.mxu1 %v1559_v12  ;;  %v412_v11 = vld [vmem:[%s3074_s1 + $0x290] sm:$0xff]  ;;  %v1577_v17 = vpack.c.bf16 %v414_v10, %v410_v9 }
  0x34   : > { %1624 = vmatprep.subr.bf16.mxu0 %v1623_v13  ;;  %v416_v12 = vld [vmem:[%s3074_s1 + $0x2b0] sm:$0xff]  ;;  %v419_v13 = vld [vmem:[%s3074_s1 + $0x2c8] sm:$0xff] }
  0x35   : > { %v1641_v19 = vpack.c.bf16 %v416_v12, %v412_v11  ;;  %v1579_v20 = vpack.c.bf16 %v423_v14, %v419_v13  ;;  %v450_v11 = vld [vmem:[%s3074_s1 + $0x3c0] sm:$0xff]  ;;  %v452_v13 = vld [vmem:[%s3074_s1 + $0x3d0] sm:$0xff] }
  0x36   : > { %878 = vperm.xlu1 %1742, %v464_v18   ;;  %v454_v12 = vld [vmem:[%s3074_s1 + $0x3e0] sm:$0xff]  ;;  %v456_v14 = vld [vmem:[%s3074_s1 + $0x3f0] sm:$0xff] }
  0x37   : > { %v1597_v15 = vpack.c.bf16 %v454_v12, %v450_v11  ;;  %v1661_v16 = vpack.c.bf16 %v456_v14, %v452_v13  ;;  %v268_v18 = vld [vmem:[%s2047_s30 + $0x10] sm:$0xff]  ;;  %v327_v11 = vld [vmem:[%s2047_s30 + $0x1e8] sm:$0xff]  ;;  %v329_v12 = vld [vmem:[%s2047_s30 + $0x1f8] sm:$0xff] }
  0x38   : > { %v326_v13 = vld [vmem:[%s2047_s30 + $0x1e0] sm:$0xff]  ;;  %v328_v14 = vld [vmem:[%s2047_s30 + $0x1f0] sm:$0xff] }
  0x3a   : > { %1562 = vmatpush1.bf16.xpose.msra.mxu1 %v1561_v24  ;;  %v422_v24 = vld [vmem:[%s3074_s1 + $0x2e0] sm:$0xff]  ;;  %881 = vperm.xlu1 %1742, %v465_v22   ;;  %v272_v22 = vld [vmem:[%s2047_s30 + $0x30] sm:$0xff] }
  0x3b   : > { %1626 = vmatpush1.bf16.xpose.msra.mxu0 %v1625_v25  ;;  %1564 = vmatprep.subr.bf16.mxu1 %v1563_v26  ;;  %v420_v25 = vld [vmem:[%s3074_s1 + $0x2d0] sm:$0xff]  ;;  %v1581_v31 = vpack.c.bf16 %v422_v24, %v418_v23  ;;  %v275_v23 = vld [vmem:[%s2047_s30 + $0x48] sm:$0xff]  ;;  %v277_v24 = vld [vmem:[%s2047_s30 + $0x58] sm:$0xff] }
  0x3c   : > { %1628 = vmatprep.subr.bf16.mxu0 %v1627_v27  ;;  %v424_v26 = vld [vmem:[%s3074_s1 + $0x2f0] sm:$0xff]  ;;  %v427_v27 = vld [vmem:[%s3074_s1 + $0x308] sm:$0xff] }
  0x3d   : > { %v1645_v33 = vpack.c.bf16 %v424_v26, %v420_v25  ;;  %v1583_v34 = vpack.c.bf16 %v431_v28, %v427_v27  ;;  %v274_v25 = vld [vmem:[%s2047_s30 + $0x40] sm:$0xff]  ;;  %v276_v26 = vld [vmem:[%s2047_s30 + $0x50] sm:$0xff]  ;;  %v279_v27 = vld [vmem:[%s2047_s30 + $0x68] sm:$0xff] }
  0x3e   : > { %884 = vperm.xlu1 %1742, %v466_v32   ;;  %v281_v28 = vld [vmem:[%s2047_s30 + $0x78] sm:$0xff] }
  0x3f   : > { %v285_v32 = vld [vmem:[%s2047_s30 + $0x98] sm:$0xff] }
  0x42   : > { %1566 = vmatpush1.bf16.xpose.msra.mxu1 %v1565_v36  ;;  %v467_v36 = vld [vmem:[%s2127_s12 + $0x40] sm:$0xff] }
  0x43   : > { %1630 = vmatpush1.bf16.xpose.msra.mxu0 %v1629_v37  ;;  %1568 = vmatprep.subr.bf16.mxu1 %v1567_v38  ;;  %v426_v37 = vld [vmem:[%s3074_s1 + $0x300] sm:$0xff] }
  0x44   : > { %1632 = vmatprep.subr.bf16.mxu0 %v1631_v39  ;;  %v430_v38 = vld [vmem:[%s3074_s1 + $0x320] sm:$0xff]  ;;  %v428_v39 = vld [vmem:[%s3074_s1 + $0x310] sm:$0xff]  ;;  %887 = vperm.xlu1 %1742, %v467_v36   ;;  %v289_v36 = vld [vmem:[%s2047_s30 + $0xb8] sm:$0xff] }
  0x45   : > { %v1585_v45 = vpack.c.bf16 %v430_v38, %v426_v37  ;;  %v1649_v47 = vpack.c.bf16 %v432_v40, %v428_v39  ;;  %v286_v37 = vld [vmem:[%s2047_s30 + $0xa0] sm:$0xff]  ;;  %v288_v38 = vld [vmem:[%s2047_s30 + $0xb0] sm:$0xff]  ;;  %v291_v39 = vld [vmem:[%s2047_s30 + $0xc8] sm:$0xff] }
  0x46   : > { %v293_v40 = vld [vmem:[%s2047_s30 + $0xd8] sm:$0xff] }
  0x48   : > { %893 = vperm.xlu1 %1742, %v469_v46   ;;  %v296_v46 = vld [vmem:[%s2047_s30 + $0xf0] sm:$0xff] }
  0x4a   : > { %1570 = vmatpush1.bf16.xpose.msra.mxu1 %v1569_v48  ;;  %v1587_v48 = vpack.c.bf16 %v439_v42, %v435_v41  ;;  %v290_v41 = vld [vmem:[%s2047_s30 + $0xc0] sm:$0xff]  ;;  %v292_v42 = vld [vmem:[%s2047_s30 + $0xd0] sm:$0xff] }
  0x4b   : > { %1634 = vmatpush1.bf16.xpose.msra.mxu0 %v1633_v49  ;;  %1572 = vmatprep.subr.bf16.mxu1 %v1571_v50  ;;  %v1651_v49 = vpack.c.bf16 %v441_v44, %v437_v43  ;;  %v471_v50 = vld [vmem:[%s2127_s12 + $0x60] sm:$0xff]  ;;  %v295_v43 = vld [vmem:[%s2047_s30 + $0xe8] sm:$0xff]  ;;  %v297_v44 = vld [vmem:[%s2047_s30 + $0xf8] sm:$0xff] }
  0x4c   : > { %1636 = vmatprep.subr.bf16.mxu0 %v1635_v52  ;;  %v438_v52 = vld [vmem:[%s3074_s1 + $0x360] sm:$0xff]  ;;  %899 = vperm.xlu1 %1742, %v471_v50   ;;  %v300_v50 = vld [vmem:[%s2047_s30 + $0x110] sm:$0xff] }
  0x4d   : > { %v1589_v59 = vpack.c.bf16 %v438_v52, %v434_v51  ;;  %v303_v51 = vld [vmem:[%s2047_s30 + $0x128] sm:$0xff]  ;;  %v305_v52 = vld [vmem:[%s2047_s30 + $0x138] sm:$0xff] }
  0x52   : > { %1574 = vmatpush1.bf16.xpose.msra.mxu1 %v1573_v1  ;;  %v444_v1 = vld [vmem:[%s3074_s1 + $0x390] sm:$0xff] }
  0x53   : > { %1638 = vmatpush1.bf16.xpose.msra.mxu0 %v1637_v4  ;;  %1576 = vmatprep.subr.bf16.mxu1 %v1575_v5  ;;  %v455_v4 = vld [vmem:[%s3074_s1 + $0x3e8] sm:$0xff]  ;;  %v453_v5 = vld [vmem:[%s3074_s1 + $0x3d8] sm:$0xff]  ;;  %v1657_v8 = vpack.c.bf16 %v448_v2, %v444_v1  ;;  %v314_v1 = vld [vmem:[%s2047_s30 + $0x180] sm:$0xff] }
  0x54   : > { %1640 = vmatprep.subr.bf16.mxu0 %v1639_v6  ;;  %v457_v6 = vld [vmem:[%s3074_s1 + $0x3f8] sm:$0xff]  ;;  %v1595_v9 = vpack.c.bf16 %v455_v4, %v451_v3  ;;  %v316_v2 = vld [vmem:[%s2047_s30 + $0x190] sm:$0xff]  ;;  %v319_v3 = vld [vmem:[%s2047_s30 + $0x1a8] sm:$0xff] }
  0x55   : > { %v1659_v10 = vpack.c.bf16 %v457_v6, %v453_v5  ;;  %v321_v4 = vld [vmem:[%s2047_s30 + $0x1b8] sm:$0xff]  ;;  %v318_v5 = vld [vmem:[%s2047_s30 + $0x1a0] sm:$0xff]  ;;  %v320_v6 = vld [vmem:[%s2047_s30 + $0x1b0] sm:$0xff] }
  0x5a   : > { %1578 = vmatpush1.bf16.xpose.msra.mxu1 %v1577_v17  ;;  %v266_v17 = vld [vmem:[%s2047_s30] sm:$0xff] }
  0x5b   : > { %1642 = vmatpush1.bf16.xpose.msra.mxu0 %v1641_v19  ;;  %1580 = vmatprep.subr.bf16.mxu1 %v1579_v20  ;;  %v271_v19 = vld [vmem:[%s2047_s30 + $0x28] sm:$0xff]  ;;  %v273_v20 = vld [vmem:[%s2047_s30 + $0x38] sm:$0xff] }
  0x5c   : > { %1644 = vmatprep.subr.bf16.mxu0 %v1643_v21  ;;  %v270_v21 = vld [vmem:[%s2047_s30 + $0x20] sm:$0xff] }
  0x62   : > { %1582 = vmatpush1.bf16.xpose.msra.mxu1 %v1581_v31  ;;  %v283_v31 = vld [vmem:[%s2047_s30 + $0x88] sm:$0xff] }
  0x63   : > { %1646 = vmatpush1.bf16.xpose.msra.mxu0 %v1645_v33  ;;  %1584 = vmatprep.subr.bf16.mxu1 %v1583_v34  ;;  %v282_v33 = vld [vmem:[%s2047_s30 + $0x80] sm:$0xff]  ;;  %v284_v34 = vld [vmem:[%s2047_s30 + $0x90] sm:$0xff] }
  0x64   : > { %1648 = vmatprep.subr.bf16.mxu0 %v1647_v35  ;;  %v287_v35 = vld [vmem:[%s2047_s30 + $0xa8] sm:$0xff] }
  0x6a   : > { %1586 = vmatpush1.bf16.xpose.msra.mxu1 %v1585_v45  ;;  %v294_v45 = vld [vmem:[%s2047_s30 + $0xe0] sm:$0xff] }
  0x6b   : > { %1650 = vmatpush1.bf16.xpose.msra.mxu0 %v1649_v47  ;;  %1588 = vmatprep.subr.bf16.mxu1 %v1587_v48  ;;  %v299_v47 = vld [vmem:[%s2047_s30 + $0x108] sm:$0xff]  ;;  %v301_v48 = vld [vmem:[%s2047_s30 + $0x118] sm:$0xff] }
  0x6c   : > { %1652 = vmatprep.subr.bf16.mxu0 %v1651_v49  ;;  %v298_v49 = vld [vmem:[%s2047_s30 + $0x100] sm:$0xff] }
  0x72   : > { %1590 = vmatpush1.bf16.xpose.msra.mxu1 %v1589_v59  ;;  %v311_v59 = vld [vmem:[%s2047_s30 + $0x168] sm:$0xff] }
  0x73   : > { %1654 = vmatpush1.bf16.xpose.msra.mxu0 %v1653_v60  ;;  %1592 = vmatprep.subr.bf16.mxu1 %v1591_v61  ;;  %v313_v60 = vld [vmem:[%s2047_s30 + $0x178] sm:$0xff]  ;;  %v310_v61 = vld [vmem:[%s2047_s30 + $0x160] sm:$0xff] }
  0x74   : > { %1656 = vmatprep.subr.bf16.mxu0 %v1655_v62  ;;  %v312_v62 = vld [vmem:[%s2047_s30 + $0x170] sm:$0xff] }
  0x7a   : > { %1594 = vmatpush1.bf16.xpose.msra.mxu1 %v1593_v7  ;;  %v323_v7 = vld [vmem:[%s2047_s30 + $0x1c8] sm:$0xff] }
  0x7b   : > { %1658 = vmatpush1.bf16.xpose.msra.mxu0 %v1657_v8  ;;  %1596 = vmatprep.subr.bf16.mxu1 %v1595_v9  ;;  %v325_v8 = vld [vmem:[%s2047_s30 + $0x1d8] sm:$0xff]  ;;  %v322_v9 = vld [vmem:[%s2047_s30 + $0x1c0] sm:$0xff] }
  0x7c   : > { %1660 = vmatprep.subr.bf16.mxu0 %v1659_v10  ;;  %v324_v10 = vld [vmem:[%s2047_s30 + $0x1d0] sm:$0xff]  ;;  %s1515_s30 = sshll.u32 %s1880_s16, 7  ;;  %s3097_s16 = smov (!%p263_p4, %s1880_s16), 1 }
  0x7d   : > { %s265_s11 = scalar_lea.vmem %s3077_s4, %s3097_s16 }
  0x82   : > { %1598 = vmatpush1.bf16.xpose.msra.mxu1 %v1597_v15  ;;  %v476_v15 = vlaneseq }
  0x83   : > { %1662 = vmatpush1.bf16.xpose.msra.mxu0 %v1661_v16 }
  0x84   : > { %v2362_v16 = vshrl.u32 %v476_v15, 7 }
  0x89   : > { %551 = vmatmul.mubr.f32.vlgmr.msra.gmra.mrb[0].mxu1 %v266_v17  ;;  %v478_v17 = vsub.s32 0, %v2362_v16 }
  0x8a   : > { %712 = vmatmul.mubr.f32.vlgmr.msra.gmra.mrb[0].mxu0 %v268_v18  ;;  %556 = vmatprep.mubr.f32.mxu1 %v271_v19  ;;  %v458_v18 = vld [vmem:[%s3075_s2] sm:$0x3]  ;;  %v482_v19 = vsub.s32 1, %v2362_v16 }
  0x8b   : > { %717 = vmatprep.mubr.f32.mxu0 %v273_v20  ;;  %v2369_v20 = vrot.slane %v458_v18, %v478_v17 }
  0x8d   : > { %557 = vmatmul.mubr.f32.gmra.mrb[2].mxu1 %v270_v21  ;;  %v2371_v21 = vrot.slane %v458_v18, %v482_v19 }
  0x8e   : > { %718 = vmatmul.mubr.f32.gmra.mrb[2].mxu0 %v272_v22  ;;  %562 = vmatprep.mubr.f32.mxu1 %v275_v23 }
  0x8f   : > { %723 = vmatprep.mubr.f32.mxu0 %v277_v24 }
  0x91   : > { %563 = vmatmul.mubr.f32.gmra.mrb[4].mxu1 %v274_v25 }
  0x92   : > { %724 = vmatmul.mubr.f32.gmra.mrb[4].mxu0 %v276_v26  ;;  %568 = vmatprep.mubr.f32.mxu1 %v279_v27 }
  0x93   : > { %729 = vmatprep.mubr.f32.mxu0 %v281_v28 }
  0x95   : > { %569 = vmatmul.mubr.f32.gmra.mrb[6].mxu1 %v278_v29 }
  0x96   : > { %730 = vmatmul.mubr.f32.gmra.mrb[6].mxu0 %v280_v30  ;;  %574 = vmatprep.mubr.f32.mxu1 %v283_v31 }
  0x97   : > { %735 = vmatprep.mubr.f32.mxu0 %v285_v32 }
  0x99   : > { %575 = vmatmul.mubr.f32.gmra.mrb[8].mxu1 %v282_v33 }
  0x9a   : > { %736 = vmatmul.mubr.f32.gmra.mrb[8].mxu0 %v284_v34  ;;  %580 = vmatprep.mubr.f32.mxu1 %v287_v35 }
  0x9b   : > { %741 = vmatprep.mubr.f32.mxu0 %v289_v36 }
  0x9d   : > { %581 = vmatmul.mubr.f32.gmra.mrb[10].mxu1 %v286_v37 }
  0x9e   : > { %742 = vmatmul.mubr.f32.gmra.mrb[10].mxu0 %v288_v38  ;;  %586 = vmatprep.mubr.f32.mxu1 %v291_v39 }
  0x9f   : > { %747 = vmatprep.mubr.f32.mxu0 %v293_v40 }
  0xa1   : > { %587 = vmatmul.mubr.f32.gmra.mrb[12].mxu1 %v290_v41 }
  0xa2   : > { %748 = vmatmul.mubr.f32.gmra.mrb[12].mxu0 %v292_v42  ;;  %592 = vmatprep.mubr.f32.mxu1 %v295_v43 }
  0xa3   : > { %753 = vmatprep.mubr.f32.mxu0 %v297_v44 }
  0xa5   : > { %593 = vmatmul.mubr.f32.gmra.mrb[14].mxu1 %v294_v45 }
  0xa6   : > { %754 = vmatmul.mubr.f32.gmra.mrb[14].mxu0 %v296_v46  ;;  %598 = vmatprep.mubr.f32.mxu1 %v299_v47 }
  0xa7   : > { %759 = vmatprep.mubr.f32.mxu0 %v301_v48 }
  0xa9   : > { %599 = vmatmul.mubr.f32.gmra.mrb[16].mxu1 %v298_v49 }
  0xaa   : > { %760 = vmatmul.mubr.f32.gmra.mrb[16].mxu0 %v300_v50  ;;  %604 = vmatprep.mubr.f32.mxu1 %v303_v51 }
  0xab   : > { %765 = vmatprep.mubr.f32.mxu0 %v305_v52 }
  0xad   : > { %605 = vmatmul.mubr.f32.gmra.mrb[18].mxu1 %v302_v53 }
  0xae   : > { %766 = vmatmul.mubr.f32.gmra.mrb[18].mxu0 %v304_v54  ;;  %610 = vmatprep.mubr.f32.mxu1 %v307_v55 }
  0xaf   : > { %771 = vmatprep.mubr.f32.mxu0 %v309_v56 }
  0xb1   : > { %611 = vmatmul.mubr.f32.gmra.mrb[20].mxu1 %v306_v57 }
  0xb2   : > { %772 = vmatmul.mubr.f32.gmra.mrb[20].mxu0 %v308_v58  ;;  %616 = vmatprep.mubr.f32.mxu1 %v311_v59 }
  0xb3   : > { %777 = vmatprep.mubr.f32.mxu0 %v313_v60 }
  0xb5   : > { %617 = vmatmul.mubr.f32.gmra.mrb[22].mxu1 %v310_v61 }
  0xb6   : > { %778 = vmatmul.mubr.f32.gmra.mrb[22].mxu0 %v312_v62  ;;  %622 = vmatprep.mubr.f32.mxu1 %v315_v63 }
  0xb7   : > { %783 = vmatprep.mubr.f32.mxu0 %v317_v0 }
  0xb9   : > { %623 = vmatmul.mubr.f32.gmra.mrb[24].mxu1 %v314_v1 }
  0xba   : > { %784 = vmatmul.mubr.f32.gmra.mrb[24].mxu0 %v316_v2  ;;  %628 = vmatprep.mubr.f32.mxu1 %v319_v3 }
  0xbb   : > { %789 = vmatprep.mubr.f32.mxu0 %v321_v4 }
  0xbd   : > { %629 = vmatmul.mubr.f32.gmra.mrb[26].mxu1 %v318_v5 }
  0xbe   : > { %790 = vmatmul.mubr.f32.gmra.mrb[26].mxu0 %v320_v6  ;;  %634 = vmatprep.mubr.f32.mxu1 %v323_v7 }
  0xbf   : > { %795 = vmatprep.mubr.f32.mxu0 %v325_v8 }
  0xc1   : > { %635 = vmatmul.mubr.f32.gmra.mrb[28].mxu1 %v322_v9 }
  0xc2   : > { %796 = vmatmul.mubr.f32.gmra.mrb[28].mxu0 %v324_v10  ;;  %640 = vmatprep.mubr.f32.mxu1 %v327_v11 }
  0xc3   : > { %801 = vmatprep.mubr.f32.mxu0 %v329_v12 }
  0xc5   : > { %641 = vmatmul.mubr.f32.gmra.mrb[30].mxu1 %v326_v13 }
  0xc6   : > { %802 = vmatmul.mubr.f32.gmra.mrb[30].mxu0 %v328_v14 }
 0x15c   : > { %v552_v22 = vpop.f32.mrb[0].mxu1 }
 0x15d   : > { %v553_v23 = vadd.f32 %v552_v22, %v2369_v20  ;;  %v554_v24 = vpop.f32.mrb[1].mxu1  ;;  %v713_v25 = vpop.f32.mrb[0].mxu0 }
 0x15e   : > { %v555_v26 = vadd.f32 %v554_v24, %v2371_v21  ;;  %v715_v27 = vpop.f32.mrb[1].mxu0 }
 0x15f   : > { %v2375_v28 = vadd.f32 %v713_v25, %v553_v23 }
 0x160   : > { %v2377_v29 = vadd.f32 %v715_v27, %v555_v26  ;;  %v558_v30 = vpop.f32.mrb[2].mxu1 }
 0x161   : > { %v559_v31 = vadd.f32 %v558_v30, %v2369_v20  ;;  %v560_v32 = vpop.f32.mrb[3].mxu1  ;;  %v719_v33 = vpop.f32.mrb[2].mxu0 }
 0x162   : > { %v561_v34 = vadd.f32 %v560_v32, %v2371_v21  ;;  %v721_v35 = vpop.f32.mrb[3].mxu0  ;;  %v942_v36 = vmax.f32 %v2375_v28, %v2377_v29 }
 0x163   : > { %v2383_v37 = vadd.f32 %v719_v33, %v559_v31 }
 0x164   : > { %v2385_v38 = vadd.f32 %v721_v35, %v561_v34  ;;  %v564_v39 = vpop.f32.mrb[4].mxu1  ;;  %943 = vmax.xlane.f32.xlu0 %v942_v36 }
 0x165   : > { %v565_v40 = vadd.f32 %v564_v39, %v2369_v20  ;;  %v566_v41 = vpop.f32.mrb[5].mxu1  ;;  %v725_v42 = vpop.f32.mrb[4].mxu0 }
 0x166   : > { %v567_v43 = vadd.f32 %v566_v41, %v2371_v21  ;;  %v727_v44 = vpop.f32.mrb[5].mxu0  ;;  %v945_v45 = vmax.f32 %v2383_v37, %v2385_v38 }
 0x167   : > { %v2391_v46 = vadd.f32 %v725_v42, %v565_v40 }
 0x168   : > { %v2393_v47 = vadd.f32 %v727_v44, %v567_v43  ;;  %v570_v48 = vpop.f32.mrb[6].mxu1  ;;  %946 = vmax.xlane.f32.xlu0 %v945_v45 }
 0x169   : > { %v571_v49 = vadd.f32 %v570_v48, %v2369_v20  ;;  %v572_v50 = vpop.f32.mrb[7].mxu1  ;;  %v731_v51 = vpop.f32.mrb[6].mxu0 }
 0x16a   : > { %v573_v52 = vadd.f32 %v572_v50, %v2371_v21  ;;  %v733_v53 = vpop.f32.mrb[7].mxu0  ;;  %v948_v54 = vmax.f32 %v2391_v46, %v2393_v47 }
 0x16b   : > { %v2399_v55 = vadd.f32 %v731_v51, %v571_v49 }
 0x16c   : > { %v2401_v56 = vadd.f32 %v733_v53, %v573_v52  ;;  %v576_v57 = vpop.f32.mrb[8].mxu1  ;;  %949 = vmax.xlane.f32.xlu1 %v948_v54 }
 0x16d   : > { %v577_v58 = vadd.f32 %v576_v57, %v2369_v20  ;;  %v578_v59 = vpop.f32.mrb[9].mxu1  ;;  %v737_v60 = vpop.f32.mrb[8].mxu0 }
 0x16e   : > { %v579_v61 = vadd.f32 %v578_v59, %v2371_v21  ;;  %v739_v62 = vpop.f32.mrb[9].mxu0  ;;  %v951_v63 = vmax.f32 %v2399_v55, %v2401_v56 }
 0x16f   : > { %v2407_v0 = vadd.f32 %v737_v60, %v577_v58 }
 0x170   : > { %v2409_v1 = vadd.f32 %v739_v62, %v579_v61  ;;  %v582_v2 = vpop.f32.mrb[10].mxu1  ;;  %952 = vmax.xlane.f32.xlu1 %v951_v63 }
 0x171   : > { %v583_v3 = vadd.f32 %v582_v2, %v2369_v20  ;;  %v584_v4 = vpop.f32.mrb[11].mxu1  ;;  %v743_v5 = vpop.f32.mrb[10].mxu0 }
 0x172   : > { %v585_v6 = vadd.f32 %v584_v4, %v2371_v21  ;;  %v745_v7 = vpop.f32.mrb[11].mxu0  ;;  %v954_v8 = vmax.f32 %v2407_v0, %v2409_v1 }
 0x173   : > { %v2415_v9 = vadd.f32 %v743_v5, %v583_v3 }
 0x174   : > { %v2417_v10 = vadd.f32 %v745_v7, %v585_v6  ;;  %v588_v11 = vpop.f32.mrb[12].mxu1  ;;  %955 = vmax.xlane.f32.xlu0 %v954_v8 }
 0x175   : > { %v589_v12 = vadd.f32 %v588_v11, %v2369_v20  ;;  %v590_v13 = vpop.f32.mrb[13].mxu1  ;;  %v749_v14 = vpop.f32.mrb[12].mxu0 }
 0x176   : > { %v591_v17 = vadd.f32 %v590_v13, %v2371_v21  ;;  %v751_v18 = vpop.f32.mrb[13].mxu0  ;;  %v957_v19 = vmax.f32 %v2415_v9, %v2417_v10 }
 0x177   : > { %v2423_v22 = vadd.f32 %v749_v14, %v589_v12 }
 0x178   : > { %v2425_v23 = vadd.f32 %v751_v18, %v591_v17  ;;  %v594_v24 = vpop.f32.mrb[14].mxu1  ;;  %958 = vmax.xlane.f32.xlu1 %v957_v19 }
 0x179   : > { %v595_v25 = vadd.f32 %v594_v24, %v2369_v20  ;;  %v596_v26 = vpop.f32.mrb[15].mxu1  ;;  %v755_v27 = vpop.f32.mrb[14].mxu0 }
 0x17a   : > { %v597_v30 = vadd.f32 %v596_v26, %v2371_v21  ;;  %v757_v31 = vpop.f32.mrb[15].mxu0  ;;  %v960_v32 = vmax.f32 %v2423_v22, %v2425_v23 }
 0x17b   : > { %v2431_v33 = vadd.f32 %v755_v27, %v595_v25 }
 0x17c   : > { %v2433_v34 = vadd.f32 %v757_v31, %v597_v30  ;;  %v600_v35 = vpop.f32.mrb[16].mxu1  ;;  %961 = vmax.xlane.f32.xlu0 %v960_v32 }
 0x17d   : > { %v601_v36 = vadd.f32 %v600_v35, %v2369_v20  ;;  %v602_v39 = vpop.f32.mrb[17].mxu1  ;;  %v761_v40 = vpop.f32.mrb[16].mxu0 }
 0x17e   : > { %v603_v41 = vadd.f32 %v602_v39, %v2371_v21  ;;  %v763_v42 = vpop.f32.mrb[17].mxu0  ;;  %v963_v43 = vmax.f32 %v2431_v33, %v2433_v34 }
 0x17f   : > { %v2439_v44 = vadd.f32 %v761_v40, %v601_v36 }
 0x180   : > { %v2441_v45 = vadd.f32 %v763_v42, %v603_v41  ;;  %v606_v48 = vpop.f32.mrb[18].mxu1  ;;  %964 = vmax.xlane.f32.xlu1 %v963_v43 }
 0x181   : > { %v607_v49 = vadd.f32 %v606_v48, %v2369_v20  ;;  %v608_v50 = vpop.f32.mrb[19].mxu1  ;;  %v767_v51 = vpop.f32.mrb[18].mxu0 }
 0x182   : > { %v609_v52 = vadd.f32 %v608_v50, %v2371_v21  ;;  %v769_v53 = vpop.f32.mrb[19].mxu0  ;;  %v966_v54 = vmax.f32 %v2439_v44, %v2441_v45 }
 0x183   : > { %v2447_v57 = vadd.f32 %v767_v51, %v607_v49 }
 0x184   : > { %v2449_v58 = vadd.f32 %v769_v53, %v609_v52  ;;  %v612_v59 = vpop.f32.mrb[20].mxu1  ;;  %967 = vmax.xlane.f32.xlu0 %v966_v54 }
 0x185   : > { %v613_v60 = vadd.f32 %v612_v59, %v2369_v20  ;;  %v614_v61 = vpop.f32.mrb[21].mxu1  ;;  %v773_v62 = vpop.f32.mrb[20].mxu0 }
 0x186   : > { %v615_v63 = vadd.f32 %v614_v61, %v2371_v21  ;;  %v775_v2 = vpop.f32.mrb[21].mxu0  ;;  %v969_v3 = vmax.f32 %v2447_v57, %v2449_v58 }
 0x187   : > { %v2455_v4 = vadd.f32 %v773_v62, %v613_v60 }
 0x188   : > { %v2457_v5 = vadd.f32 %v775_v2, %v615_v63  ;;  %v618_v6 = vpop.f32.mrb[22].mxu1  ;;  %970 = vmax.xlane.f32.xlu1 %v969_v3 }
 0x189   : > { %v619_v7 = vadd.f32 %v618_v6, %v2369_v20  ;;  %v620_v8 = vpop.f32.mrb[23].mxu1  ;;  %v779_v11 = vpop.f32.mrb[22].mxu0 }
 0x18a   : > { %v621_v12 = vadd.f32 %v620_v8, %v2371_v21  ;;  %v781_v13 = vpop.f32.mrb[23].mxu0  ;;  %v972_v14 = vmax.f32 %v2455_v4, %v2457_v5 }
 0x18b   : > { %v2463_v17 = vadd.f32 %v779_v11, %v619_v7 }
 0x18c   : > { %v2465_v18 = vadd.f32 %v781_v13, %v621_v12  ;;  %v624_v19 = vpop.f32.mrb[24].mxu1  ;;  %973 = vmax.xlane.f32.xlu0 %v972_v14 }
 0x18d   : > { %v625_v24 = vadd.f32 %v624_v19, %v2369_v20  ;;  %v626_v25 = vpop.f32.mrb[25].mxu1  ;;  %v785_v26 = vpop.f32.mrb[24].mxu0 }
 0x18e   : > { %v627_v27 = vadd.f32 %v626_v25, %v2371_v21  ;;  %v787_v30 = vpop.f32.mrb[25].mxu0  ;;  %v975_v31 = vmax.f32 %v2463_v17, %v2465_v18  ;;  %v474_v25 = vld [vmem:[%s2127_s12 + $0x78] sm:$0xff] }
 0x18f   : > { %v2471_v32 = vadd.f32 %v785_v26, %v625_v24  ;;  %v473_v24 = vld [vmem:[%s2127_s12 + $0x70] sm:$0xff] }
 0x190   : > { %v2473_v35 = vadd.f32 %v787_v30, %v627_v27  ;;  %v630_v36 = vpop.f32.mrb[26].mxu1  ;;  %976 = vmax.xlane.f32.xlu1 %v975_v31  ;;  %v864_v30 = vpop.permute.xlu0 %863 }
 0x191   : > { %v631_v39 = vadd.f32 %v630_v36, %v2369_v20  ;;  %v632_v40 = vpop.f32.mrb[27].mxu1  ;;  %v791_v41 = vpop.f32.mrb[26].mxu0 }
 0x192   : > { %v633_v42 = vadd.f32 %v632_v40, %v2371_v21  ;;  %v793_v43 = vpop.f32.mrb[27].mxu0  ;;  %v978_v48 = vmax.f32 %v2471_v32, %v2473_v35 }
 0x193   : > { %v2479_v49 = vadd.f32 %v791_v41, %v631_v39 }
 0x194   : > { %v2481_v50 = vadd.f32 %v793_v43, %v633_v42  ;;  %v636_v51 = vpop.f32.mrb[28].mxu1  ;;  %979 = vmax.xlane.f32.xlu0 %v978_v48 }
 0x195   : > { %v637_v52 = vadd.f32 %v636_v51, %v2369_v20  ;;  %v638_v53 = vpop.f32.mrb[29].mxu1  ;;  %v797_v54 = vpop.f32.mrb[28].mxu0 }
 0x196   : > { %v639_v59 = vadd.f32 %v638_v53, %v2371_v21  ;;  %v799_v60 = vpop.f32.mrb[29].mxu0  ;;  %v981_v61 = vmax.f32 %v2479_v49, %v2481_v50 }
 0x197   : > { %v2487_v62 = vadd.f32 %v797_v54, %v637_v52 }
 0x198   : > { %v2489_v63 = vadd.f32 %v799_v60, %v639_v59  ;;  %v642_v2 = vpop.f32.mrb[30].mxu1  ;;  %982 = vmax.xlane.f32.xlu1 %v981_v61 }
 0x199   : > { %v643_v3 = vadd.f32 %v642_v2, %v2369_v20  ;;  %v644_v6 = vpop.f32.mrb[31].mxu1  ;;  %v803_v7 = vpop.f32.mrb[30].mxu0 }
 0x19a   : > { %v645_v8 = vadd.f32 %v644_v6, %v2371_v21  ;;  %v805_v11 = vpop.f32.mrb[31].mxu0  ;;  %v984_v12 = vmax.f32 %v2487_v62, %v2489_v63  ;;  %v867_v20 = vpop.permute.xlu1 %866  ;;  %v2504_v21 = vand.u32 127, %v476_v15 }
 0x19b   : > { %v2495_v13 = vadd.f32 %v803_v7, %v643_v3  ;;  %v2533_v7 = vpop.permute.xlu0 %890 }
 0x19c   : > { %v2497_v14 = vadd.f32 %v805_v11, %v645_v8  ;;  %985 = vmax.xlane.f32.xlu0 %v984_v12  ;;  %v2507_v27 = vadd.s32 128, %v2504_v21  ;;  %vm912_vm0 = vcmp.eq.s32.totalorder %v2504_v21, %v867_v20  ;;  %vm910_vm2 = vcmp.eq.s32.totalorder %v2504_v21, %v864_v30 }
 0x19d   : > { %v1184_v36 = vsel %vm912_vm0, %v2383_v37, 0.0  ;;  %v1182_v40 = vsel %vm910_vm2, %v2375_v28, 0.0 }
 0x19e   : > { %v987_v19 = vmax.f32 %v2495_v13, %v2497_v14  ;;  %v870_v26 = vpop.permute.xlu1 %869  ;;  %vm913_vm1 = vcmp.eq.s32.totalorder %v2507_v27, %v867_v20  ;;  %vm911_vm3 = vcmp.eq.s32.totalorder %v2507_v27, %v864_v30 }
 0x19f   : > { %v1185_v39 = vsel %vm913_vm1, %v2385_v38, 0.0  ;;  %vm914_vm4 = vcmp.eq.s32.totalorder %v2504_v21, %v870_v26  ;;  %vm915_vm5 = vcmp.eq.s32.totalorder %v2507_v27, %v870_v26  ;;  %v1183_v41 = vsel %vm911_vm3, %v2377_v29, 0.0  ;;  %v2537_v11 = vpop.permute.xlu0 %896 }
 0x1a0   : > { %988 = vmax.xlane.f32.xlu1 %v987_v19  ;;  %v1217_v15 = vadd.f32 %v1185_v39, %v1184_v36  ;;  %v1186_v42 = vsel %vm914_vm4, %v2391_v46, 0.0  ;;  %v1187_v43 = vsel %vm915_vm5, %v2393_v47, 0.0  ;;  %v1214_v51 = vadd.f32 %v1183_v41, %v1182_v40 }
 0x1a1   : > { %v1220_v52 = vadd.f32 %v1187_v43, %v1186_v42 }
 0x1a2   : > { %v873_v31 = vpop.permute.xlu1 %872 }
 0x1a3   : > { %vm916_vm6 = vcmp.eq.s32.totalorder %v2504_v21, %v873_v31  ;;  %vm917_vm7 = vcmp.eq.s32.totalorder %v2507_v27, %v873_v31  ;;  %v2541_v19 = vpop.permute.xlu0 %902 }
 0x1a4   : > { %v1188_v53 = vsel %vm916_vm6, %v2399_v55, 0.0  ;;  %v1189_v54 = vsel %vm917_vm7, %v2401_v56, 0.0 }
 0x1a5   : > { %v1223_v59 = vadd.f32 %v1189_v54, %v1188_v53 }
 0x1a6   : > { %v876_v48 = vpop.permute.xlu1 %875 }
 0x1a7   : > { %vm918_vm8 = vcmp.eq.s32.totalorder %v2504_v21, %v876_v48  ;;  %vm919_vm9 = vcmp.eq.s32.totalorder %v2507_v27, %v876_v48 }
 0x1a8   : > { %v1190_v60 = vsel %vm918_vm8, %v2407_v0, 0.0  ;;  %v1191_v61 = vsel %vm919_vm9, %v2409_v1, 0.0  ;;  %vm928_vm8 = vcmp.eq.s32.totalorder %v2504_v21, %v2533_v7  ;;  %vm929_vm9 = vcmp.eq.s32.totalorder %v2507_v27, %v2533_v7 }
 0x1a9   : > { %v1226_v3 = vadd.f32 %v1191_v61, %v1190_v60 }
 0x1aa   : > { %v2529_v2 = vpop.permute.xlu1 %878 }
 0x1ab   : > { %vm920_vm10 = vcmp.eq.s32.totalorder %v2504_v21, %v2529_v2  ;;  %vm921_vm11 = vcmp.eq.s32.totalorder %v2507_v27, %v2529_v2 }
 0x1ae   : > { %v2531_v6 = vpop.permute.xlu1 %881 }
 0x1af   : > { %vm922_vm12 = vcmp.eq.s32.totalorder %v2504_v21, %v2531_v6  ;;  %vm923_vm13 = vcmp.eq.s32.totalorder %v2507_v27, %v2531_v6 }
 0x1b1   : > { %905 = vperm.xlu1 %1742, %v473_v24  }
 0x1b2   : > { %908 = vperm.xlu0 %1741, %v474_v25   ;;  %v2535_v8 = vpop.permute.xlu1 %884 }
 0x1b3   : > { %vm924_vm14 = vcmp.eq.s32.totalorder %v2504_v21, %v2535_v8  ;;  %vm925_vm15 = vcmp.eq.s32.totalorder %v2507_v27, %v2535_v8 }
 0x1b4   : > { %v1197_v6 = vsel %vm925_vm15, %v2433_v34, 0.0 }
 0x1b6   : > { %v2539_v12 = vpop.permute.xlu1 %887 }
 0x1b7   : > { %vm926_vm0 = vcmp.eq.s32.totalorder %v2504_v21, %v2539_v12  ;;  %vm927_vm1 = vcmp.eq.s32.totalorder %v2507_v27, %v2539_v12 }
 0x1b8   : > { %v1199_v12 = vsel %vm927_vm1, %v2441_v45, 0.0  ;;  %vm1294_vm1 = vcmask 7168  }
 0x1ba   : > { %v2543_v24 = vpop.permute.xlu1 %893 }
 0x1bb   : > { %vm930_vm2 = vcmp.eq.s32.totalorder %v2504_v21, %v2543_v24  ;;  %vm931_vm3 = vcmp.eq.s32.totalorder %v2507_v27, %v2543_v24 }
 0x1be   : > { %v2551_v36 = vpop.permute.xlu1 %899 }
 0x1bf   : > { %vm934_vm4 = vcmp.eq.s32.totalorder %v2504_v21, %v2551_v36  ;;  %vm935_vm5 = vcmp.eq.s32.totalorder %v2507_v27, %v2551_v36 }
 0x1d1   : > { %1218 = vadd.xlane.f32.xlu0 %v1217_v15 }
 0x1d5   : > { %1215 = vadd.xlane.f32.xlu1 %v1214_v51  ;;  %1221 = vadd.xlane.f32.xlu0 %v1220_v52 }
 0x1d9   : > { %1224 = vadd.xlane.f32.xlu0 %v1223_v59 }
 0x1dd   : > { %1227 = vadd.xlane.f32.xlu0 %v1226_v3 }
 0x1f1   : > { %v2545_v25 = vpop.xlane.xlu0 %943 }
 0x1f2   : > { %v990_v20 = vsub.f32 %v2375_v28, %v2545_v25  ;;  %v991_v26 = vsub.f32 %v2377_v29, %v2545_v25 }
 0x1f4   : > { %v1022_v30 = vmul.f32 1.442695, %v990_v20  ;;  %v1024_v31 = vmul.f32 1.442695, %v991_v26 }
 0x1f5   : > { %v2553_v39 = vpop.xlane.xlu0 %946 }
 0x1f6   : > { %1743 = vpow2.f32 %v1022_v30  ;;  %v992_v15 = vsub.f32 %v2383_v37, %v2553_v39  ;;  %v993_v40 = vsub.f32 %v2385_v38, %v2553_v39 }
 0x1f7   : > { %1745 = vpow2.f32 %v1024_v31 }
 0x1f8   : > { %v1026_v41 = vmul.f32 1.442695, %v992_v15  ;;  %v1028_v42 = vmul.f32 1.442695, %v993_v40 }
 0x1f9   : > { %v2559_v28 = vpop.xlane.xlu1 %949 }
 0x1fa   : > { %1747 = vpow2.f32 %v1026_v41  ;;  %v994_v29 = vsub.f32 %v2391_v46, %v2559_v28  ;;  %v995_v43 = vsub.f32 %v2393_v47, %v2559_v28 }
 0x1fb   : > { %1749 = vpow2.f32 %v1028_v42 }
 0x1fc   : > { %v1030_v48 = vmul.f32 1.442695, %v994_v29  ;;  %v1032_v51 = vmul.f32 1.442695, %v995_v43 }
 0x1fd   : > { %v2565_v52 = vpop.xlane.xlu1 %952 }
 0x1fe   : > { %1751 = vpow2.f32 %v1030_v48  ;;  %v996_v37 = vsub.f32 %v2399_v55, %v2565_v52  ;;  %v997_v38 = vsub.f32 %v2401_v56, %v2565_v52 }
 0x1ff   : > { %1753 = vpow2.f32 %v1032_v51 }
 0x200   : > { %v1744_v53 = vpop.eup %1743  ;;  %v1034_v54 = vmul.f32 1.442695, %v996_v37  ;;  %v1036_v59 = vmul.f32 1.442695, %v997_v38 }
 0x201   : > { %v1746_v46 = vpop.eup %1745  ;;  %v2571_v60 = vpop.xlane.xlu0 %955 }
 0x202   : > { %1755 = vpow2.f32 %v1034_v54  ;;  %v998_v47 = vsub.f32 %v2407_v0, %v2571_v60  ;;  %v999_v61 = vsub.f32 %v2409_v1, %v2571_v60  ;;  %v1086_v3 = vadd.f32 %v1746_v46, %v1744_v53 }
 0x203   : > { %1757 = vpow2.f32 %v1036_v59 }
 0x204   : > { %v1748_v55 = vpop.eup %1747  ;;  %v1038_v20 = vmul.f32 1.442695, %v998_v47  ;;  %v1040_v26 = vmul.f32 1.442695, %v999_v61  ;;  %1087 = vadd.xlane.f32.xlu1 %v1086_v3 }
 0x205   : > { %v1750_v56 = vpop.eup %1749  ;;  %v2577_v30 = vpop.xlane.xlu1 %958 }
 0x206   : > { %1759 = vpow2.f32 %v1038_v20  ;;  %v1000_v31 = vsub.f32 %v2415_v9, %v2577_v30  ;;  %v1001_v15 = vsub.f32 %v2417_v10, %v2577_v30  ;;  %v1089_v0 = vadd.f32 %v1750_v56, %v1748_v55 }
 0x207   : > { %1761 = vpow2.f32 %v1040_v26 }
 0x208   : > { %v1752_v40 = vpop.eup %1751  ;;  %v1042_v1 = vmul.f32 1.442695, %v1000_v31  ;;  %v1044_v41 = vmul.f32 1.442695, %v1001_v15  ;;  %1090 = vadd.xlane.f32.xlu0 %v1089_v0 }
 0x209   : > { %v1754_v42 = vpop.eup %1753  ;;  %v2583_v29 = vpop.xlane.xlu0 %961 }
 0x20a   : > { %1763 = vpow2.f32 %v1042_v1  ;;  %v1002_v43 = vsub.f32 %v2423_v22, %v2583_v29  ;;  %v1003_v48 = vsub.f32 %v2425_v23, %v2583_v29  ;;  %v1092_v51 = vadd.f32 %v1754_v42, %v1752_v40 }
 0x20b   : > { %1765 = vpow2.f32 %v1044_v41 }
 0x20c   : > { %v1756_v37 = vpop.eup %1755  ;;  %v1046_v38 = vmul.f32 1.442695, %v1002_v43  ;;  %v1048_v53 = vmul.f32 1.442695, %v1003_v48  ;;  %1093 = vadd.xlane.f32.xlu0 %v1092_v51 }
 0x20d   : > { %v1758_v54 = vpop.eup %1757  ;;  %v2589_v59 = vpop.xlane.xlu1 %964 }
 0x20e   : > { %1767 = vpow2.f32 %v1046_v38  ;;  %v1004_v46 = vsub.f32 %v2431_v33, %v2589_v59  ;;  %v1005_v47 = vsub.f32 %v2433_v34, %v2589_v59  ;;  %v1095_v61 = vadd.f32 %v1758_v54, %v1756_v37 }
 0x20f   : > { %1769 = vpow2.f32 %v1048_v53 }
 0x210   : > { %v1760_v3 = vpop.eup %1759  ;;  %v1050_v55 = vmul.f32 1.442695, %v1004_v46  ;;  %v1052_v20 = vmul.f32 1.442695, %v1005_v47  ;;  %1096 = vadd.xlane.f32.xlu1 %v1095_v61 }
 0x211   : > { %v1762_v26 = vpop.eup %1761  ;;  %v2595_v56 = vpop.xlane.xlu0 %967 }
 0x212   : > { %1771 = vpow2.f32 %v1050_v55  ;;  %v1006_v31 = vsub.f32 %v2439_v44, %v2595_v56  ;;  %v1007_v15 = vsub.f32 %v2441_v45, %v2595_v56  ;;  %v1098_v0 = vadd.f32 %v1762_v26, %v1760_v3 }
 0x213   : > { %1773 = vpow2.f32 %v1052_v20  ;;  %v1203_v45 = vsel %vm931_vm3, %v2457_v5, 0.0 }
 0x214   : > { %v1764_v40 = vpop.eup %1763  ;;  %v1054_v1 = vmul.f32 1.442695, %v1006_v31  ;;  %v1056_v41 = vmul.f32 1.442695, %v1007_v15  ;;  %1099 = vadd.xlane.f32.xlu0 %v1098_v0 }
 0x215   : > { %v1766_v42 = vpop.eup %1765  ;;  %v2601_v43 = vpop.xlane.xlu1 %970 }
 0x216   : > { %1775 = vpow2.f32 %v1054_v1  ;;  %v1008_v48 = vsub.f32 %v2447_v57, %v2601_v43  ;;  %v1009_v51 = vsub.f32 %v2449_v58, %v2601_v43  ;;  %v1101_v37 = vadd.f32 %v1766_v42, %v1764_v40 }
 0x217   : > { %1777 = vpow2.f32 %v1056_v41 }
 0x218   : > { %v1768_v38 = vpop.eup %1767  ;;  %v1058_v53 = vmul.f32 1.442695, %v1008_v48  ;;  %v1060_v54 = vmul.f32 1.442695, %v1009_v51  ;;  %1102 = vadd.xlane.f32.xlu1 %v1101_v37 }
 0x219   : > { %v1770_v46 = vpop.eup %1769  ;;  %v2607_v47 = vpop.xlane.xlu0 %973 }
 0x21a   : > { %1779 = vpow2.f32 %v1058_v53  ;;  %v1010_v61 = vsub.f32 %v2455_v4, %v2607_v47  ;;  %v1011_v3 = vsub.f32 %v2457_v5, %v2607_v47  ;;  %v1104_v55 = vadd.f32 %v1770_v46, %v1768_v38 }
 0x21b   : > { %1781 = vpow2.f32 %v1060_v54  ;;  %v1192_v53 = vsel %vm920_vm10, %v2415_v9, 0.0  ;;  %v1193_v54 = vsel %vm921_vm11, %v2417_v10, 0.0  ;;  %vm932_vm10 = vcmp.eq.s32.totalorder %v2504_v21, %v2537_v11 }
 0x21c   : > { %v1772_v20 = vpop.eup %1771  ;;  %v1062_v26 = vmul.f32 1.442695, %v1010_v61  ;;  %v1064_v31 = vmul.f32 1.442695, %v1011_v3  ;;  %1105 = vadd.xlane.f32.xlu0 %v1104_v55  ;;  %v1229_v2 = vadd.f32 %v1193_v54, %v1192_v53  ;;  %vm933_vm11 = vcmp.eq.s32.totalorder %v2507_v27, %v2537_v11 }
 0x21d   : > { %v1774_v15 = vpop.eup %1773  ;;  %v2617_v0 = vpop.xlane.xlu1 %976  ;;  %v1205_v7 = vsel %vm933_vm11, %v2465_v18, 0.0 }
 0x21e   : > { %1783 = vpow2.f32 %v1062_v26  ;;  %v1012_v40 = vsub.f32 %v2463_v17, %v2617_v0  ;;  %v1013_v1 = vsub.f32 %v2465_v18, %v2617_v0  ;;  %v1107_v41 = vadd.f32 %v1774_v15, %v1772_v20 }
 0x21f   : > { %1785 = vpow2.f32 %v1064_v31  ;;  %v1194_v31 = vsel %vm922_vm12, %v2423_v22, 0.0  ;;  %v1195_v15 = vsel %vm923_vm13, %v2425_v23, 0.0  ;;  %v1196_v23 = vsel %vm924_vm14, %v2431_v33, 0.0 }
 0x220   : > { %v1776_v42 = vpop.eup %1775  ;;  %v1066_v48 = vmul.f32 1.442695, %v1012_v40  ;;  %v1068_v51 = vmul.f32 1.442695, %v1013_v1  ;;  %1108 = vadd.xlane.f32.xlu1 %v1107_v41  ;;  %v1232_v53 = vadd.f32 %v1195_v15, %v1194_v31  ;;  %v1198_v31 = vsel %vm926_vm0, %v2439_v44, 0.0 }
 0x221   : > { %v1778_v37 = vpop.eup %1777  ;;  %v2627_v38 = vpop.xlane.xlu0 %979  ;;  %v1202_v44 = vsel %vm930_vm2, %v2455_v4, 0.0  ;;  %vm936_vm12 = vcmp.eq.s32.totalorder %v2504_v21, %v2541_v19  ;;  %vm937_vm13 = vcmp.eq.s32.totalorder %v2507_v27, %v2541_v19 }
 0x222   : > { %1787 = vpow2.f32 %v1066_v48  ;;  %v1014_v46 = vsub.f32 %v2471_v32, %v2627_v38  ;;  %v1015_v61 = vsub.f32 %v2473_v35, %v2627_v38  ;;  %v1110_v3 = vadd.f32 %v1778_v37, %v1776_v42 }
 0x223   : > { %1789 = vpow2.f32 %v1068_v51 }
 0x224   : > { %v1780_v55 = vpop.eup %1779  ;;  %v1070_v20 = vmul.f32 1.442695, %v1014_v46  ;;  %v1072_v9 = vmul.f32 1.442695, %v1015_v61  ;;  %1111 = vadd.xlane.f32.xlu0 %v1110_v3 }
 0x225   : > { %v1782_v26 = vpop.eup %1781  ;;  %v2645_v10 = vpop.xlane.xlu1 %982 }
 0x226   : > { %1791 = vpow2.f32 %v1070_v20  ;;  %v1016_v40 = vsub.f32 %v2479_v49, %v2645_v10  ;;  %v1017_v1 = vsub.f32 %v2481_v50, %v2645_v10  ;;  %v1113_v41 = vadd.f32 %v1782_v26, %v1780_v55 }
 0x227   : > { %1793 = vpow2.f32 %v1072_v9  ;;  %v1235_v20 = vadd.f32 %v1197_v6, %v1196_v23  ;;  %v1206_v6 = vsel %vm934_vm4, %v2471_v32, 0.0 }
 0x228   : > { %v1784_v42 = vpop.eup %1783  ;;  %v1074_v48 = vmul.f32 1.442695, %v1016_v40  ;;  %v1076_v51 = vmul.f32 1.442695, %v1017_v1  ;;  %1114 = vadd.xlane.f32.xlu1 %v1113_v41  ;;  %1230 = vadd.xlane.f32.xlu0 %v1229_v2 }
 0x229   : > { %v1786_v22 = vpop.eup %1785  ;;  %v2659_v37 = vpop.xlane.xlu0 %985 }
 0x22a   : > { %1795 = vpow2.f32 %v1074_v48  ;;  %v1018_v54 = vsub.f32 %v2487_v62, %v2659_v37  ;;  %v1019_v46 = vsub.f32 %v2489_v63, %v2659_v37  ;;  %v1116_v61 = vadd.f32 %v1786_v22, %v1784_v42 }
 0x22b   : > { %1797 = vpow2.f32 %v1076_v51  ;;  %v1238_v42 = vadd.f32 %v1199_v12, %v1198_v31 }
 0x22c   : > { %v1788_v3 = vpop.eup %1787  ;;  %v1078_v33 = vmul.f32 1.442695, %v1018_v54  ;;  %v1080_v55 = vmul.f32 1.442695, %v1019_v46  ;;  %1233 = vadd.xlane.f32.xlu0 %v1232_v53  ;;  %1117 = vadd.xlane.f32.xlu1 %v1116_v61  ;;  %v1244_v53 = vadd.f32 %v1203_v45, %v1202_v44  ;;  %v1207_v54 = vsel %vm935_vm5, %v2473_v35, 0.0 }
 0x22d   : > { %v1790_v34 = vpop.eup %1789  ;;  %v2677_v8 = vpop.xlane.xlu1 %988  ;;  %v1250_v46 = vadd.f32 %v1207_v54, %v1206_v6  ;;  %v812_v45 = vadd.s32 24, %v2362_v16 }
 0x22e   : > { %1799 = vpow2.f32 %v1078_v33  ;;  %v1020_v9 = vsub.f32 %v2495_v13, %v2677_v8  ;;  %v1021_v26 = vsub.f32 %v2497_v14, %v2677_v8  ;;  %v1119_v2 = vadd.f32 %v1790_v34, %v1788_v3 }
 0x22f   : > { %1801 = vpow2.f32 %v1080_v55  ;;  %v1200_v34 = vsel %vm928_vm8, %v2447_v57, 0.0 }
 0x230   : > { %v1792_v15 = vpop.eup %1791  ;;  %v1082_v40 = vmul.f32 1.442695, %v1020_v9  ;;  %v1084_v1 = vmul.f32 1.442695, %v1021_v26  ;;  %1236 = vadd.xlane.f32.xlu0 %v1235_v20  ;;  %1120 = vadd.xlane.f32.xlu1 %v1119_v2  ;;  %v1201_v20 = vsel %vm929_vm9, %v2449_v58, 0.0  ;;  %v1208_v9 = vsel %vm936_vm12, %v2479_v49, 0.0 }
 0x231   : > { %v1794_v41 = vpop.eup %1793  ;;  %v906_v22 = vpop.permute.xlu1 %905  ;;  %v1209_v26 = vsel %vm937_vm13, %v2481_v50, 0.0 }
 0x232   : > { %1803 = vpow2.f32 %v1082_v40  ;;  %v1122_v48 = vadd.f32 %v1794_v41, %v1792_v15  ;;  %vm938_vm6 = vcmp.eq.s32.totalorder %v2504_v21, %v906_v22  ;;  %vm939_vm7 = vcmp.eq.s32.totalorder %v2507_v27, %v906_v22  ;;  %v909_v57 = vpop.permute.xlu0 %908 }
 0x233   : > { %1805 = vpow2.f32 %v1084_v1  ;;  %v1210_v61 = vsel %vm938_vm6, %v2487_v62, 0.0  ;;  %v1211_v3 = vsel %vm939_vm7, %v2489_v63, 0.0  ;;  %v1241_v62 = vadd.f32 %v1201_v20, %v1200_v34 }
 0x234   : > { %v1796_v51 = vpop.eup %1795  ;;  %1239 = vadd.xlane.f32.xlu0 %v1238_v42  ;;  %1123 = vadd.xlane.f32.xlu1 %v1122_v48  ;;  %v1256_v32 = vadd.f32 %v1211_v3, %v1210_v61  ;;  %v1204_v63 = vsel %vm932_vm10, %v2463_v17, 0.0  ;;  %vm940_vm14 = vcmp.eq.s32.totalorder %v2504_v21, %v909_v57  ;;  %vm941_vm15 = vcmp.eq.s32.totalorder %v2507_v27, %v909_v57 }
 0x235   : > { %v1798_v24 = vpop.eup %1797  ;;  %v1247_v58 = vadd.f32 %v1205_v7, %v1204_v63  ;;  %v1253_v17 = vadd.f32 %v1209_v26, %v1208_v9  ;;  %v1212_v18 = vsel %vm940_vm14, %v2495_v13, 0.0  ;;  %v1213_v11 = vsel %vm941_vm15, %v2497_v14, 0.0 }
 0x236   : > { %v1125_v23 = vadd.f32 %v1798_v24, %v1796_v51  ;;  %v1259_v19 = vadd.f32 %v1213_v11, %v1212_v18  ;;  %v810_v41 = vadd.s32 8, %v2362_v16  ;;  %v2735_v42 = vstv %s1515_s30 }
 0x237   : > { %v811_v48 = vadd.s32 16, %v2362_v16  ;;  %v2740_v44 = vadd.s32 %v2735_v42, %v2362_v16  ;;  %v813_v51 = vadd.s32 32, %v2362_v16  ;;  %v814_v3 = vadd.s32 40, %v2362_v16 }
 0x238   : > { %v1800_v4 = vpop.eup %1799  ;;  %1245 = vadd.xlane.f32.xlu0 %v1244_v53  ;;  %1126 = vadd.xlane.f32.xlu1 %v1125_v23  ;;  %v2745_v23 = vadd.s32 %v2735_v42, %v810_v41 }
 0x239   : > { %v1802_v5 = vpop.eup %1801  ;;  %v2748_v6 = vadd.s32 %v2735_v42, %v811_v48  ;;  %vm843_vm0 = vcmp.lt.s32.totalorder %v2740_v44, 200  ;;  %v2780_v9 = vadd.s32 %v2735_v42, %v814_v3  ;;  %v818_v48 = vadd.s32 72, %v2362_v16 }
 0x23a   : > { %v1128_v36 = vadd.f32 %v1802_v5, %v1800_v4  ;;  %v2752_v5 = vadd.s32 %v2735_v42, %v812_v45  ;;  %vm844_vm3 = vcmp.lt.s32.totalorder %v2745_v23, 200  ;;  %v820_v45 = vadd.s32 88, %v2362_v16 }
 0x23b   : > { %vm845_vm5 = vcmp.lt.s32.totalorder %v2748_v6, 200  ;;  %vm848_vm14 = vcmp.lt.s32.totalorder %v2780_v9, 200 }
 0x23c   : > { %v1804_v33 = vpop.eup %1803  ;;  %1251 = vadd.xlane.f32.xlu0 %v1250_v46  ;;  %1129 = vadd.xlane.f32.xlu1 %v1128_v36  ;;  %v2755_v46 = vadd.s32 %v2735_v42, %v813_v51  ;;  %vm846_vm6 = vcmp.lt.s32.totalorder %v2752_v5, 200 }
 0x23d   : > { %v1806_v55 = vpop.eup %1805 }
 0x23e   : > { %v1131_v35 = vadd.f32 %v1806_v55, %v1804_v33  ;;  %v815_v33 = vadd.s32 48, %v2362_v16  ;;  %v816_v55 = vadd.s32 56, %v2362_v16  ;;  %vm847_vm7 = vcmp.lt.s32.totalorder %v2755_v46, 200 }
 0x240   : > { %1257 = vadd.xlane.f32.xlu0 %v1256_v32  ;;  %1132 = vadd.xlane.f32.xlu1 %v1131_v35  ;;  %v817_v35 = vadd.s32 64, %v2362_v16  ;;  %v2788_v18 = vadd.s32 %v2735_v42, %v816_v55 }
 0x244   : > { %1242 = vadd.xlane.f32.xlu1 %v1241_v62  ;;  %v819_v62 = vadd.s32 80, %v2362_v16 }
 0x248   : > { %1248 = vadd.xlane.f32.xlu1 %v1247_v58 }
 0x24c   : > { %1254 = vadd.xlane.f32.xlu1 %v1253_v17  ;;  %v2785_v17 = vadd.s32 %v2735_v42, %v815_v33 }
 0x24e   : > { %vm849_vm15 = vcmp.lt.s32.totalorder %v2785_v17, 200 }
 0x250   : > { %1260 = vadd.xlane.f32.xlu1 %v1259_v19  ;;  %v2799_v19 = vadd.s32 %v2735_v42, %v817_v35 }
 0x25e   : > { %v2723_v2 = vpop.xlane.xlu0 %1218 }
 0x25f   : > { %vm1336_vm4 = vcmp.eq.f32.partialorder %v2723_v2, %v2553_v39 }
 0x260   : > { %vm1352_vm9 = vmand %vm844_vm3, %vm1336_vm4 }
 0x262   : > { %v2725_v31 = vpop.xlane.xlu0 %1221  ;;  %v2731_v12 = vpop.xlane.xlu1 %1215 }
 0x263   : > { %vm1335_vm2 = vcmp.eq.f32.partialorder %v2731_v12, %v2545_v25  ;;  %vm1337_vm10 = vcmp.eq.f32.partialorder %v2725_v31, %v2559_v28 }
 0x264   : > { %vm2772_vm8 = vmand %vm843_vm0, %vm1335_vm2 }
 0x265   : > { %vm2818_vm11 = vmand %vm845_vm5, %vm1337_vm10 }
 0x266   : > { %v2727_v49 = vpop.xlane.xlu0 %1224 }
 0x267   : > { %vm1338_vm12 = vcmp.eq.f32.partialorder %v2727_v49, %v2565_v52 }
 0x268   : > { %vm2847_vm2 = vmand %vm846_vm6, %vm1338_vm12 }
 0x26a   : > { %v2729_v50 = vpop.xlane.xlu0 %1227 }
 0x26b   : > { %vm1339_vm13 = vcmp.eq.f32.partialorder %v2729_v50, %v2571_v60 }
 0x26c   : > { %vm2866_vm4 = vmand %vm847_vm7, %vm1339_vm13 }
 0x291   : > { %v1088_v15 = vpop.xlane.xlu1 %1087 }
 0x292   : > { %1807 = vlog2.f32 %v1088_v15 }
 0x295   : > { %v1091_v27 = vpop.xlane.xlu0 %1090 }
 0x296   : > { %1809 = vlog2.f32 %v1091_v27 }
 0x299   : > { %v1094_v40 = vpop.xlane.xlu0 %1093 }
 0x29a   : > { %1811 = vlog2.f32 %v1094_v40 }
 0x29c   : > { %v1808_v22 = vpop.eup %1807 }
 0x29d   : > { %v1097_v13 = vpop.xlane.xlu1 %1096  ;;  %v1135_v36 = vmul.f32 0.6931472, %v1808_v22 }
 0x29e   : > { %1813 = vlog2.f32 %v1097_v13  ;;  %v2803_v13 = vadd.s32 %v2735_v42, %v819_v62 }
 0x29f   : > { %v1166_v57 = vadd.f32 %v1135_v36, %v2545_v25 }
 0x2a0   : > { %v1810_v53 = vpop.eup %1809 }
 0x2a1   : > { %v1100_v14 = vpop.xlane.xlu0 %1099  ;;  %v1137_v32 = vmul.f32 0.6931472, %v1810_v53  ;;  %v1262_v22 = vsub.f32 %v1166_v57, %v2731_v12 }
 0x2a2   : > { %1815 = vlog2.f32 %v1100_v14  ;;  %v821_v14 = vadd.s32 96, %v2362_v16 }
 0x2a3   : > { %v1167_v25 = vadd.f32 %v1137_v32, %v2553_v39  ;;  %v823_v39 = vadd.s32 112, %v2362_v16 }
 0x2a4   : > { %v1812_v4 = vpop.eup %1811  ;;  %v2837_v12 = vadd.s32 %v2735_v42, %v821_v14 }
 0x2a5   : > { %v1103_v1 = vpop.xlane.xlu1 %1102  ;;  %v1139_v20 = vmul.f32 0.6931472, %v1812_v4  ;;  %v1263_v4 = vsub.f32 %v1167_v25, %v2723_v2 }
 0x2a6   : > { %1817 = vlog2.f32 %v1103_v1  ;;  %v1848_v1 = vmov 0.0   ;;  %vm855_vm12 = vcmp.lt.s32.totalorder %v2837_v12, 200 }
 0x2a7   : > { %v1168_v15 = vadd.f32 %v1139_v20, %v2559_v28  ;;  %v1516_v41 = vsel %vm2772_vm8, 1.0, %v1848_v1  ;;  %v1517_v51 = vsel %vm1352_vm9, 1.0, %v1848_v1  ;;  %v1518_v2 = vsel %vm2818_vm11, 1.0, %v1848_v1 }
 0x2a8   : > { %v1814_v34 = vpop.eup %1813  ;;  %v1399_v3 = vsel %vm1294_vm1, %v1516_v41, 0.0  ;;  %v2858_v20 = vadd.s32 %v2735_v42, %v820_v45  ;;  %v1400_v62 = vsel %vm1294_vm1, %v1517_v51, 0.0  ;;  %vm850_vm8 = vcmp.lt.s32.totalorder %v2788_v18, 200 }
 0x2a9   : > { %v1106_v24 = vpop.xlane.xlu0 %1105  ;;  %v1141_v11 = vmul.f32 0.6931472, %v1814_v34  ;;  %v1264_v33 = vsub.f32 %v1168_v15, %v2725_v31  ;;  %v2852_v31 = vadd.s32 %v2735_v42, %v823_v39  ;;  %v2855_v34 = vadd.s32 %v2735_v42, %v818_v48 }
 0x2aa   : > { %1819 = vlog2.f32 %v1106_v24  ;;  %v1401_v15 = vadd.f32 %v1400_v62, %v1399_v3  ;;  %v1402_v44 = vsel %vm1294_vm1, %v1518_v2, 0.0  ;;  %v1519_v45 = vsel %vm2847_vm2, 1.0, %v1848_v1 }
 0x2ab   : > { %v1169_v36 = vadd.f32 %v1141_v11, %v2565_v52  ;;  %v822_v11 = vadd.s32 104, %v2362_v16  ;;  %v1280_v41 = vsel %vm845_vm5, %v1264_v33, 0.0  ;;  %vm853_vm9 = vcmp.lt.s32.totalorder %v2803_v13, 200 }
 0x2ac   : > { %v1816_v63 = vpop.eup %1815  ;;  %v1403_v3 = vadd.f32 %v1402_v44, %v1401_v15  ;;  %v1404_v5 = vsel %vm1294_vm1, %v1519_v45, 0.0  ;;  %v824_v15 = vadd.s32 120, %v2362_v16 }
 0x2ad   : > { %v1109_v54 = vpop.xlane.xlu1 %1108  ;;  %v1143_v40 = vmul.f32 0.6931472, %v1816_v63  ;;  %v1278_v63 = vsel %vm843_vm0, %v1262_v22, 0.0  ;;  %vm851_vm0 = vcmp.lt.s32.totalorder %v2799_v19, 200  ;;  %v1298_v22 = vsel %vm1294_vm1, %v1280_v41, 0.0 }
 0x2ae   : > { %1821 = vlog2.f32 %v1109_v54  ;;  %v1295_v23 = vsel %vm1294_vm1, %v1278_v63, 0.0  ;;  %v1405_v9 = vadd.f32 %v1404_v5, %v1403_v3 }
 0x2af   : > { %v1170_v55 = vadd.f32 %v1143_v40, %v2571_v60  ;;  %v1279_v60 = vsel %vm844_vm3, %v1263_v4, 0.0  ;;  %v1265_v40 = vsub.f32 %v1169_v36, %v2727_v49  ;;  %v1520_v49 = vsel %vm2866_vm4, 1.0, %v1848_v1 }
 0x2b0   : > { %v1818_v27 = vpop.eup %1817  ;;  %v1296_v6 = vsel %vm1294_vm1, %v1279_v60, 0.0  ;;  %v1406_v33 = vsel %vm1294_vm1, %v1520_v49, 0.0 }
 0x2b1   : > { %v1112_v61 = vpop.xlane.xlu0 %1111  ;;  %v1266_v39 = vsub.f32 %v1170_v55, %v2729_v50  ;;  %v1297_v55 = vadd.f32 %v1296_v6, %v1295_v23  ;;  %v1407_v44 = vadd.f32 %v1406_v33, %v1405_v9 }
 0x2b2   : > { %1823 = vlog2.f32 %v1112_v61  ;;  %v1145_v61 = vmul.f32 0.6931472, %v1818_v27 }
 0x2b3   : > { %v1299_v35 = vadd.f32 %v1298_v22, %v1297_v55 }
 0x2b4   : > { %v1820_v28 = vpop.eup %1819  ;;  %v1171_v14 = vadd.f32 %v1145_v61, %v2577_v30 }
 0x2b5   : > { %v2777_v58 = vpop.xlane.xlu1 %1114  ;;  %v2782_v26 = vpop.xlane.xlu0 %1230  ;;  %v1147_v7 = vmul.f32 0.6931472, %v1820_v28 }
 0x2b6   : > { %vm1340_vm3 = vcmp.eq.f32.partialorder %v2782_v26, %v2577_v30  ;;  %v1267_v28 = vsub.f32 %v1171_v14, %v2782_v26 }
 0x2b7   : > { %v1172_v50 = vadd.f32 %v1147_v7, %v2583_v29 }
 0x2b8   : > { %v1822_v32 = vpop.eup %1821  ;;  %v1283_v52 = vsel %vm848_vm14, %v1267_v28, 0.0 }
 0x2b9   : > { %v1118_v53 = vpop.xlane.xlu1 %1117  ;;  %v2828_v54 = vpop.xlane.xlu0 %1233  ;;  %v1149_v48 = vmul.f32 0.6931472, %v1822_v32  ;;  %v1304_v60 = vsel %vm1294_vm1, %v1283_v52, 0.0 }
 0x2ba   : > { %1825 = vlog2.f32 %v1118_v53  ;;  %v1281_v53 = vsel %vm846_vm6, %v1265_v40, 0.0  ;;  %vm1341_vm5 = vcmp.eq.f32.partialorder %v2828_v54, %v2583_v29  ;;  %vm1356_vm6 = vmand %vm848_vm14, %vm1340_vm3  ;;  %v1268_v32 = vsub.f32 %v1172_v50, %v2828_v54 }
 0x2bb   : > { %1827 = vlog2.f32 %v2777_v58  ;;  %v1282_v58 = vsel %vm847_vm7, %v1266_v39, 0.0  ;;  %v1173_v36 = vadd.f32 %v1149_v48, %v2589_v59  ;;  %v1300_v46 = vsel %vm1294_vm1, %v1281_v53, 0.0  ;;  %vm1357_vm10 = vmand %vm849_vm15, %vm1341_vm5 }
 0x2bc   : > { %v1824_v27 = vpop.eup %1823  ;;  %v1302_v62 = vsel %vm1294_vm1, %v1282_v58, 0.0  ;;  %v1521_v7 = vsel %vm1356_vm6, 1.0, %v1848_v1  ;;  %v2944_v54 = vadd.s32 %v2735_v42, %v822_v11  ;;  %v1284_v40 = vsel %vm849_vm15, %v1268_v32, 0.0 }
 0x2bd   : > { %v1121_v57 = vpop.xlane.xlu1 %1120  ;;  %v2873_v25 = vpop.xlane.xlu0 %1236  ;;  %v1151_v51 = vmul.f32 0.6931472, %v1824_v27  ;;  %v1301_v27 = vadd.f32 %v1300_v46, %v1299_v35  ;;  %v1522_v14 = vsel %vm1357_vm10, 1.0, %v1848_v1  ;;  %vm852_vm14 = vcmp.lt.s32.totalorder %v2855_v34, 200 }
 0x2be   : > { %1829 = vlog2.f32 %v1121_v57  ;;  %vm1342_vm7 = vcmp.eq.f32.partialorder %v2873_v25, %v2589_v59  ;;  %v1269_v57 = vsub.f32 %v1173_v36, %v2873_v25  ;;  %v1408_v39 = vsel %vm1294_vm1, %v1521_v7, 0.0 }
 0x2bf   : > { %v1174_v2 = vadd.f32 %v1151_v51, %v2595_v56  ;;  %vm2939_vm13 = vmand %vm850_vm8, %vm1342_vm7  ;;  %v1303_v41 = vadd.f32 %v1302_v62, %v1301_v27  ;;  %v1306_v23 = vsel %vm1294_vm1, %v1284_v40, 0.0  ;;  %v1410_v6 = vsel %vm1294_vm1, %v1522_v14, 0.0 }
 0x2c0   : > { %v1285_v48 = vsel %vm850_vm8, %v1269_v57, 0.0  ;;  %v1523_v45 = vsel %vm2939_vm13, 1.0, %v1848_v1  ;;  %v2973_v50 = vadd.s32 %v2735_v42, %v824_v15  ;;  %v1409_v22 = vadd.f32 %v1408_v39, %v1407_v44 }
 0x2c1   : > { %v2897_v24 = vpop.xlane.xlu0 %1239  ;;  %v1124_v4 = vpop.xlane.xlu1 %1123  ;;  %v1305_v49 = vadd.f32 %v1304_v60, %v1303_v41  ;;  %v1412_v58 = vsel %vm1294_vm1, %v1523_v45, 0.0  ;;  %vm857_vm3 = vcmp.lt.s32.totalorder %v2852_v31, 200  ;;  %vm854_vm5 = vcmp.lt.s32.totalorder %v2858_v20, 200 }
 0x2c2   : > { %1831 = vlog2.f32 %v1124_v4  ;;  %vm1343_vm11 = vcmp.eq.f32.partialorder %v2897_v24, %v2595_v56  ;;  %v1270_v59 = vsub.f32 %v1174_v2, %v2897_v24  ;;  %v1308_v4 = vsel %vm1294_vm1, %v1285_v48, 0.0 }
 0x2c3   : > { %vm2959_vm2 = vmand %vm851_vm0, %vm1343_vm11  ;;  %v1307_v3 = vadd.f32 %v1306_v23, %v1305_v49  ;;  %v1411_v5 = vadd.f32 %v1410_v6, %v1409_v22  ;;  %vm856_vm6 = vcmp.lt.s32.totalorder %v2944_v54, 200  ;;  %vm858_vm10 = vcmp.lt.s32.totalorder %v2973_v50, 200 }
 0x2c4   : > { %v1826_v61 = vpop.eup %1825  ;;  %v1286_v53 = vsel %vm851_vm0, %v1270_v59, 0.0  ;;  %v1524_v28 = vsel %vm2959_vm2, 1.0, %v1848_v1 }
 0x2c5   : > { %v1155_v63 = vmul.f32 0.6931472, %v1826_v61  ;;  %v1127_v30 = vpop.xlane.xlu1 %1126  ;;  %v1246_v26 = vpop.xlane.xlu0 %1245  ;;  %v1310_v33 = vsel %vm1294_vm1, %v1286_v53, 0.0  ;;  %v1414_v55 = vsel %vm1294_vm1, %v1524_v28, 0.0  ;;  %v1309_v2 = vadd.f32 %v1308_v4, %v1307_v3 }
 0x2c6   : > { %1833 = vlog2.f32 %v1127_v30  ;;  %v1828_v25 = vpop.eup %1827  ;;  %vm1345_vm15 = vcmp.eq.f32.partialorder %v1246_v26, %v2607_v47  ;;  %v1413_v35 = vadd.f32 %v1412_v58, %v1411_v5 }
 0x2c7   : > { %v1176_v17 = vadd.f32 %v1155_v63, %v2607_v47  ;;  %v1153_v18 = vmul.f32 0.6931472, %v1828_v25  ;;  %vm1361_vm4 = vmand %vm853_vm9, %vm1345_vm15 }
 0x2c8   : > { %v1830_v56 = vpop.eup %1829  ;;  %v1526_v47 = vsel %vm1361_vm4, 1.0, %v1848_v1 }
 0x2c9   : > { %v1130_v11 = vpop.xlane.xlu1 %1129  ;;  %v1252_v51 = vpop.xlane.xlu0 %1251  ;;  %v1272_v61 = vsub.f32 %v1176_v17, %v1246_v26  ;;  %v1157_v19 = vmul.f32 0.6931472, %v1830_v56  ;;  %v1175_v62 = vadd.f32 %v1153_v18, %v2601_v43  ;;  %v1415_v26 = vadd.f32 %v1414_v55, %v1413_v35 }
 0x2ca   : > { %1835 = vlog2.f32 %v1130_v11  ;;  %vm1347_vm8 = vcmp.eq.f32.partialorder %v1252_v51, %v2627_v38  ;;  %v1418_v9 = vsel %vm1294_vm1, %v1526_v47, 0.0 }
 0x2cb   : > { %v1288_v52 = vsel %vm853_vm9, %v1272_v61, 0.0  ;;  %vm2996_vm0 = vmand %vm855_vm12, %vm1347_vm8  ;;  %v1177_v29 = vadd.f32 %v1157_v19, %v2617_v0 }
 0x2cc   : > { %v1832_v24 = vpop.eup %1831  ;;  %v1314_v60 = vsel %vm1294_vm1, %v1288_v52, 0.0  ;;  %v1528_v40 = vsel %vm2996_vm0, 1.0, %v1848_v1  ;;  %vm1439_vm0 = vcmp.eq.s32.totalorder %v2504_v21, 0 }
 0x2cd   : > { %v1159_v36 = vmul.f32 0.6931472, %v1832_v24  ;;  %v1133_v42 = vpop.xlane.xlu1 %1132  ;;  %v1258_v7 = vpop.xlane.xlu0 %1257  ;;  %v1422_v11 = vsel %vm1294_vm1, %v1528_v40, 0.0 }
 0x2ce   : > { %1837 = vlog2.f32 %v1133_v42  ;;  %vm1349_vm11 = vcmp.eq.f32.partialorder %v1258_v7, %v2659_v37 }
 0x2cf   : > { %v1178_v46 = vadd.f32 %v1159_v36, %v2627_v38  ;;  %v1311_v38 = vadd.f32 %v1310_v33, %v1309_v2  ;;  %vm3029_vm2 = vmand %vm857_vm3, %vm1349_vm11 }
 0x2d0   : > { %v1834_v32 = vpop.eup %1833  ;;  %v1530_v36 = vsel %vm3029_vm2, 1.0, %v1848_v1 }
 0x2d1   : > { %v1243_v30 = vpop.xlane.xlu1 %1242  ;;  %v1161_v13 = vmul.f32 0.6931472, %v1834_v32  ;;  %v1274_v27 = vsub.f32 %v1178_v46, %v1252_v51  ;;  %v1426_v54 = vsel %vm1294_vm1, %v1530_v36, 0.0 }
 0x2d2   : > { %v1271_v57 = vsub.f32 %v1175_v62, %v1243_v30  ;;  %vm1344_vm7 = vcmp.eq.f32.partialorder %v1243_v30, %v2601_v43 }
 0x2d3   : > { %vm1360_vm9 = vmand %vm852_vm14, %vm1344_vm7  ;;  %v1290_v34 = vsel %vm855_vm12, %v1274_v27, 0.0  ;;  %v1179_v45 = vadd.f32 %v1161_v13, %v2645_v10 }
 0x2d4   : > { %v1836_v15 = vpop.eup %1835  ;;  %v1287_v14 = vsel %vm852_vm14, %v1271_v57, 0.0  ;;  %v1525_v43 = vsel %vm1360_vm9, 1.0, %v1848_v1  ;;  %v1318_v58 = vsel %vm1294_vm1, %v1290_v34, 0.0 }
 0x2d5   : > { %v1163_v59 = vmul.f32 0.6931472, %v1836_v15  ;;  %v1312_v25 = vsel %vm1294_vm1, %v1287_v14, 0.0  ;;  %v1416_v44 = vsel %vm1294_vm1, %v1525_v43, 0.0  ;;  %v1249_v41 = vpop.xlane.xlu1 %1248 }
 0x2d6   : > { %v1313_v39 = vadd.f32 %v1312_v25, %v1311_v38  ;;  %v1417_v16 = vadd.f32 %v1416_v44, %v1415_v26  ;;  %v1273_v17 = vsub.f32 %v1177_v29, %v1249_v41  ;;  %vm1346_vm13 = vcmp.eq.f32.partialorder %v1249_v41, %v2617_v0 }
 0x2d7   : > { %v1180_v48 = vadd.f32 %v1163_v59, %v2659_v37  ;;  %vm1362_vm14 = vmand %vm854_vm5, %vm1346_vm13 }
 0x2d8   : > { %v1838_v56 = vpop.eup %1837  ;;  %v1289_v0 = vsel %vm854_vm5, %v1273_v17, 0.0  ;;  %v1315_v12 = vadd.f32 %v1314_v60, %v1313_v39  ;;  %v1527_v23 = vsel %vm1362_vm14, 1.0, %v1848_v1  ;;  %v1419_v6 = vadd.f32 %v1418_v9, %v1417_v16 }
 0x2d9   : > { %v1165_v37 = vmul.f32 0.6931472, %v1838_v56  ;;  %v1276_v51 = vsub.f32 %v1180_v48, %v1258_v7  ;;  %v1316_v24 = vsel %vm1294_vm1, %v1289_v0, 0.0  ;;  %v1420_v18 = vsel %vm1294_vm1, %v1527_v23, 0.0  ;;  %v1255_v22 = vpop.xlane.xlu1 %1254 }
 0x2da   : > { %v1317_v53 = vadd.f32 %v1316_v24, %v1315_v12  ;;  %v1421_v28 = vadd.f32 %v1420_v18, %v1419_v6  ;;  %v1275_v4 = vsub.f32 %v1179_v45, %v1255_v22  ;;  %vm1348_vm12 = vcmp.eq.f32.partialorder %v1255_v22, %v2645_v10 }
 0x2db   : > { %v1292_v20 = vsel %vm857_vm3, %v1276_v51, 0.0  ;;  %vm1364_vm15 = vmand %vm856_vm6, %vm1348_vm12  ;;  %v1181_v61 = vadd.f32 %v1165_v37, %v2677_v8 }
 0x2dc   : > { %v1291_v42 = vsel %vm856_vm6, %v1275_v4, 0.0  ;;  %v1529_v3 = vsel %vm1364_vm15, 1.0, %v1848_v1  ;;  %v1423_v10 = vadd.f32 %v1422_v11, %v1421_v28  ;;  %v1319_v5 = vadd.f32 %v1318_v58, %v1317_v53 }
 0x2dd   : > { %v1320_v19 = vsel %vm1294_vm1, %v1291_v42, 0.0  ;;  %v1424_v31 = vsel %vm1294_vm1, %v1529_v3, 0.0  ;;  %v1261_v33 = vpop.xlane.xlu1 %1260  ;;  %v1322_v2 = vsel %vm1294_vm1, %v1292_v20, 0.0 }
 0x2de   : > { %v1277_v55 = vsub.f32 %v1181_v61, %v1261_v33  ;;  %vm1350_vm4 = vcmp.eq.f32.partialorder %v1261_v33, %v2677_v8  ;;  %v1425_v46 = vadd.f32 %v1424_v31, %v1423_v10  ;;  %v1321_v32 = vadd.f32 %v1320_v19, %v1319_v5 }
 0x2df   : > { %vm1366_vm8 = vmand %vm858_vm10, %vm1350_vm4 }
 0x2e0   : > { %v1531_v35 = vsel %vm1366_vm8, 1.0, %v1848_v1  ;;  %v1427_v47 = vadd.f32 %v1426_v54, %v1425_v46  ;;  %v1293_v62 = vsel %vm858_vm10, %v1277_v55, 0.0  ;;  %v1323_v52 = vadd.f32 %v1322_v2, %v1321_v32 }
 0x2e1   : > { %v1428_v63 = vsel %vm1294_vm1, %v1531_v35, 0.0  ;;  %v1324_v8 = vsel %vm1294_vm1, %v1293_v62, 0.0  ;;  %vm1440_vm1 = vcmp.eq.s32.totalorder %v2504_v21, 1 }
 0x2e2   : > { %v1429_v30 = vadd.f32 %v1428_v63, %v1427_v47  ;;  %v1325_v38 = vadd.f32 %v1324_v8, %v1323_v52 }
 0x2e4   : > { %1430 = vadd.xlane.f32.xlu1 %v1429_v30  ;;  %1326 = vadd.xlane.f32.xlu0 %v1325_v38 }
 0x371   : > { %v1431_v26 = vpop.xlane.xlu1 %1430  ;;  %v1327_v7 = vpop.xlane.xlu0 %1326 }
 0x372   : > { %v1432_v57 = vrot.slane %v1431_v26, 4  ;;  %v1328_v13 = vrot.slane %v1327_v7, 4 }
 0x374   : > { %v1433_v1 = vadd.f32 %v1432_v57, %v1431_v26  ;;  %v1329_v9 = vadd.f32 %v1328_v13, %v1327_v7 }
 0x376   : > { %v1434_v27 = vrot.slane %v1433_v1, 2  ;;  %v1330_v50 = vrot.slane %v1329_v9, 2 }
 0x378   : > { %v1435_v29 = vadd.f32 %v1434_v27, %v1433_v1  ;;  %v1331_v15 = vadd.f32 %v1330_v50, %v1329_v9 }
 0x37a   : > { %v1332_v60 = vrot.slane %v1331_v15, 1  ;;  %v1436_v40 = vrot.slane %v1435_v29, 1 }
 0x37c   : > { %v1333_v14 = vadd.f32 %v1332_v60, %v1331_v15  ;;  %v1437_v43 = vadd.f32 %v1436_v40, %v1435_v29 }
 0x37e   : > { %1727 = vpush %v1333_v14 }
 0x37f   : > { %1729 = vpush %v1437_v43 }
 0x3af   : > { %s1728_s12 = spop %1727 }
 0x3b0   : > { %v1443_v59 = vstv %s1728_s12  ;;  %s1730_s8 = spop %1729 }
 0x3b1   : > { %v1441_v25 = vstv %s1730_s8 }
 0x3b2   : > { %v1442_v44 = vsel %vm1440_vm1, %v1441_v25, 0.0 }
 0x3b3   : > { %v1444_v41 = vsel %vm1439_vm0, %v1443_v59, %v1442_v44 }
 0x3b4   : > { %1445 = vst [vmem:[%s265_s11] sm:$0x1] %v1444_v41 }
 0x3b5 PF: > { %s14_s15 = sadd.s32 1, %s1845_s15  }
 0x3b6   : > { %p11_p5 = scmp.ge.s32.totalorder %s14_s15, 4  }
 0x3b8   :  { %13 = sbr.rel (!%p11_p5) target bundleno = 1 (0x1), region = 69 }

</bundles_post_ra>
